<compile_context>
chip_gen: v6e
topology: v6e:2x2x1
jax: 0.10.0
libtpu: 0.0.40
codegen_flags: <defaults>
</compile_context>

<pallas_src>
import functools

import jax
import jax.numpy as jnp
from jax import lax
from jax.experimental import pallas as pl
from jax.experimental.pallas import tpu as pltpu

_LANE = 128


def _round_up(x, m):
    return ((x + m - 1) // m) * m


def gru_end_kernel(x_ref, wih_ref, whh_ref, bias_ref, selt_ref, out_ref, *,
                   seq_len, hidden):
    """One batch tile, batch on the lane axis.

    x_ref:    (L, TB)   input features, transposed
    wih_ref:  (3H, L)   fused input->hidden weights, gate order [r; z; n]
    whh_ref:  (3H, H)   fused hidden->hidden weights
    bias_ref: (4H, 1)   [b_ir+b_hr ; b_iz+b_hz ; b_in ; b_hn]
    selt_ref: (L, H)    sel^T with sel^T[i, j] = (j // 5 == i)
    out_ref:  (L, TB)   output, transposed
    """
    L, H = seq_len, hidden
    TB = x_ref.shape[1]

    x = x_ref[...]                               # (L, TB)
    w_hh = whh_ref[...]                          # (3H, H)  loop-invariant load
    bias = bias_ref[...]                         # (4H, 1)

    # The module feeds the SAME feature vector x[b, :] at every timestep, so the
    # input->hidden pre-activations are one fused matmul, computed once per tile.
    gx = jnp.dot(wih_ref[...], x, preferred_element_type=jnp.float32)   # (3H, TB)
    gx = gx + jnp.broadcast_to(bias[0:3 * H], (3 * H, TB))
    gx_r = gx[0:H]
    gx_z = gx[H:2 * H]
    gx_n = gx[2 * H:3 * H]
    # b_hn stays inside r*(.) in the GRU formula; broadcast it ONCE, outside the
    # unrolled loop (JAX does not CSE broadcast_in_dim).
    b_hn = jnp.broadcast_to(bias[3 * H:4 * H], (H, TB))

    def step(_, h):
        # Single fused hh matmul per step; gate slices are sublane/tile aligned.
        gh = jnp.dot(w_hh, h, preferred_element_type=jnp.float32)       # (3H, TB)
        r = jax.nn.sigmoid(gx_r + gh[0:H])
        z = jax.nn.sigmoid(gx_z + gh[H:2 * H])
        n = jnp.tanh(gx_n + r * (gh[2 * H:3 * H] + b_hn))
        return n + z * (h - n)                   # == (1 - z) * n + z * h

    # L is a small static trip count: unroll so the LLO scheduler can overlap the
    # MXU push/pop of step i with the EUP/VPU tail of step i-1.
    h = lax.fori_loop(0, L, step, jnp.zeros((H, TB), jnp.float32), unroll=True)

    # out[i, b] = sum_{k<5} h[5*i + k, b]  ==  sel^T @ h  (lane-dense epilogue).
    out_ref[...] = jnp.dot(selt_ref[...], h, preferred_element_type=jnp.float32)


def lstm_end_forward(x, w_ih, w_hh, b_ih, b_hh, *, seq_len, block_b=256):
    B, L = x.shape
    assert L == seq_len, "GRU input_size requires input.size(1) == seq_len"
    H = 5 * seq_len

    w_ih = jnp.asarray(w_ih, jnp.float32)            # (3H, L), gate rows [r; z; n]
    w_hh = jnp.asarray(w_hh, jnp.float32)            # (3H, H)
    b_ih = jnp.asarray(b_ih, jnp.float32)            # (3H,)
    b_hh = jnp.asarray(b_hh, jnp.float32)            # (3H,)

    # One resident bias array: b_hh folds into b_ih for the r/z gates; b_in stays
    # outside r*(.) and b_hn stays inside (PyTorch GRU semantics).
    bias = jnp.concatenate([
        b_ih[0:H] + b_hh[0:H],
        b_ih[H:2 * H] + b_hh[H:2 * H],
        b_ih[2 * H:3 * H],
        b_hh[2 * H:3 * H],
    ]).reshape(4 * H, 1)

    # reshape(B, L, 5).sum(-1) as a matmul: sel^T[i, j] = (j // 5 == i).
    sel_t = (jnp.arange(H)[None, :] // 5 == jnp.arange(L)[:, None]).astype(jnp.float32)

    # Batch goes on the LANE axis.
    x_t = jnp.asarray(x, jnp.float32).T              # (L, B)

    b_min = _round_up(B, _LANE)
    tb = min(block_b, b_min)
    if b_min > _LANE:
        # Ensure >= 2 grid steps so both v7x TensorCores get work (noop for tiny B,
        # negligible per-step overhead on v5e/v6e).
        tb = min(tb, _round_up(-(-b_min // 2), _LANE))
    b_pad = _round_up(b_min, tb)
    if b_pad != B:
        x_t = jnp.pad(x_t, ((0, 0), (0, b_pad - B)))

    kernel = functools.partial(gru_end_kernel, seq_len=L, hidden=H)
    out_t = pl.pallas_call(
        kernel,
        out_shape=jax.ShapeDtypeStruct((L, b_pad), jnp.float32),
        grid_spec=pltpu.PrefetchScalarGridSpec(
            num_scalar_prefetch=0,
            grid=(b_pad // tb,),
            in_specs=[
                pl.BlockSpec((L, tb), lambda i: (0, i)),       # x^T, tiled over batch lanes
                pl.BlockSpec((3 * H, L), lambda i: (0, 0)),    # resident fused W_ih
                pl.BlockSpec((3 * H, H), lambda i: (0, 0)),    # resident fused W_hh
                pl.BlockSpec((4 * H, 1), lambda i: (0, 0)),    # resident biases
                pl.BlockSpec((L, H), lambda i: (0, 0)),        # resident sel^T
            ],
            out_specs=pl.BlockSpec((L, tb), lambda i: (0, i)),
        ),
        compiler_params=pltpu.CompilerParams(
            dimension_semantics=("parallel",),       # megacore-split the batch
            vmem_limit_bytes=32 * 1024 * 1024,
        ),
    )(x_t, w_ih, w_hh, bias, sel_t)

    return out_t[:, :B].T                            # back to (B, L)


def lstm_end_reference(x, w_ih, w_hh, b_ih, b_hh, *, seq_len):
    """Pure-JAX reference matching PyTorch nn.GRU (gate order r, z, n)."""
    B, L = x.shape
    H = 5 * seq_len
    gx = x @ w_ih.T + b_ih
    h = jnp.zeros((B, H), jnp.float32)
    for _ in range(L):
        gh = h @ w_hh.T + b_hh
        r = jax.nn.sigmoid(gx[:, :H] + gh[:, :H])
        z = jax.nn.sigmoid(gx[:, H:2 * H] + gh[:, H:2 * H])
        n = jnp.tanh(gx[:, 2 * H:] + r * gh[:, 2 * H:])
        h = (1.0 - z) * n + z * h
    return h.reshape(B, L, 5).sum(axis=2)


if __name__ == "__main__":
    seq_len = 8           # L
    batch = 2             # B
    hidden = 5 * seq_len  # H = 40

    key = jax.random.PRNGKey(0)
    k_x, k_wih, k_whh, k_bih, k_bhh = jax.random.split(key, 5)

    # PyTorch GRU default init: U(-1/sqrt(H), 1/sqrt(H)), gate order [r, z, n].
    bound = 1.0 / jnp.sqrt(jnp.float32(hidden))
    w_ih = jax.random.uniform(k_wih, (3 * hidden, seq_len), jnp.float32, -bound, bound)
    w_hh = jax.random.uniform(k_whh, (3 * hidden, hidden), jnp.float32, -bound, bound)
    b_ih = jax.random.uniform(k_bih, (3 * hidden,), jnp.float32, -bound, bound)
    b_hh = jax.random.uniform(k_bhh, (3 * hidden,), jnp.float32, -bound, bound)

    x = jax.random.normal(k_x, (batch, seq_len), jnp.float32)

    out = lstm_end_forward(x, w_ih, w_hh, b_ih, b_hh, seq_len=seq_len)
    out = jax.block_until_ready(out)

    ref = lstm_end_reference(x, w_ih, w_hh, b_ih, b_hh, seq_len=seq_len)
    assert out.shape == (batch, seq_len)
    assert jnp.allclose(out, ref, atol=1e-4, rtol=1e-4), "mismatch vs reference"

    print("KERNEL_OK")
</pallas_src>

<mosaic_0001>
module attributes {stable_mosaic.version = 11 : i64} {
  func.func @gru_end_kernel(%arg0: i32, %arg1: memref<8x128xf32, #tpu.memory_space<vmem>>, %arg2: memref<120x8xf32, #tpu.memory_space<vmem>>, %arg3: memref<120x40xf32, #tpu.memory_space<vmem>>, %arg4: memref<160x1xf32, #tpu.memory_space<vmem>>, %arg5: memref<8x40xf32, #tpu.memory_space<vmem>>, %arg6: memref<8x128xf32, #tpu.memory_space<vmem>>) attributes {dimension_semantics = [#tpu.dimension_semantics<parallel>], iteration_bounds = array<i64: 1>, scalar_prefetch = 0 : i64, scratch_operands = 0 : i64, tpu.core_type = #tpu.core_type<tc>, window_params = [{transform_indices = @transform_0, window_bounds = array<i64: 8, 128>}, {pipeline_mode = #tpu.pipeline_mode<synchronous>, transform_indices = @transform_1, window_bounds = array<i64: 120, 8>}, {pipeline_mode = #tpu.pipeline_mode<synchronous>, transform_indices = @transform_2, window_bounds = array<i64: 120, 40>}, {pipeline_mode = #tpu.pipeline_mode<synchronous>, transform_indices = @transform_3, window_bounds = array<i64: 160, 1>}, {pipeline_mode = #tpu.pipeline_mode<synchronous>, transform_indices = @transform_4, window_bounds = array<i64: 8, 40>}, {transform_indices = @transform_5, window_bounds = array<i64: 8, 128>}]} {
    %c0 = arith.constant 0 : index
    %c0_0 = arith.constant 0 : index
    %0 = vector.load %arg1[%c0, %c0_0] : memref<8x128xf32, #tpu.memory_space<vmem>>, vector<8x128xf32>
    %c0_1 = arith.constant 0 : index
    %c0_2 = arith.constant 0 : index
    %1 = vector.load %arg3[%c0_1, %c0_2] : memref<120x40xf32, #tpu.memory_space<vmem>>, vector<120x40xf32>
    %c0_3 = arith.constant 0 : index
    %c0_4 = arith.constant 0 : index
    %2 = vector.load %arg4[%c0_3, %c0_4] : memref<160x1xf32, #tpu.memory_space<vmem>>, vector<160x1xf32>
    %c0_5 = arith.constant 0 : index
    %c0_6 = arith.constant 0 : index
    %3 = vector.load %arg2[%c0_5, %c0_6] : memref<120x8xf32, #tpu.memory_space<vmem>>, vector<120x8xf32>
    %cst = arith.constant dense<0.000000e+00> : vector<120x128xf32>
    %4 = tpu.matmul %3, %0, %cst {dimension_numbers = #tpu.dot_dimension_numbers<[1], [0], [0], [1], [0, 0, 1, 1], [], []>} : vector<120x8xf32>, vector<8x128xf32>, vector<120x128xf32> -> vector<120x128xf32>
    %5 = vector.extract_strided_slice %2 {offsets = [0, 0], sizes = [120, 1], strides = [1, 1]} : vector<160x1xf32> to vector<120x1xf32>
    %6 = vector.shape_cast %5 : vector<120x1xf32> to vector<120x1xf32>
    %7 = vector.broadcast %6 : vector<120x1xf32> to vector<120x128xf32>
    %8 = arith.addf %4, %7 : vector<120x128xf32>
    %9 = vector.extract_strided_slice %8 {offsets = [0, 0], sizes = [40, 128], strides = [1, 1]} : vector<120x128xf32> to vector<40x128xf32>
    %10 = vector.extract_strided_slice %8 {offsets = [40, 0], sizes = [40, 128], strides = [1, 1]} : vector<120x128xf32> to vector<40x128xf32>
    %11 = vector.extract_strided_slice %8 {offsets = [80, 0], sizes = [40, 128], strides = [1, 1]} : vector<120x128xf32> to vector<40x128xf32>
    %12 = vector.extract_strided_slice %2 {offsets = [120, 0], sizes = [40, 1], strides = [1, 1]} : vector<160x1xf32> to vector<40x1xf32>
    %13 = vector.shape_cast %12 : vector<40x1xf32> to vector<40x1xf32>
    %14 = vector.broadcast %13 : vector<40x1xf32> to vector<40x128xf32>
    %cst_7 = arith.constant 0.000000e+00 : f32
    %15 = vector.broadcast %cst_7 : f32 to vector<40x128xf32>
    %c0_i32 = arith.constant 0 : i32
    %cst_8 = arith.constant dense<0.000000e+00> : vector<120x128xf32>
    %16 = tpu.matmul %1, %15, %cst_8 {dimension_numbers = #tpu.dot_dimension_numbers<[1], [0], [0], [1], [0, 0, 1, 1], [], []>} : vector<120x40xf32>, vector<40x128xf32>, vector<120x128xf32> -> vector<120x128xf32>
    %17 = vector.extract_strided_slice %16 {offsets = [0, 0], sizes = [40, 128], strides = [1, 1]} : vector<120x128xf32> to vector<40x128xf32>
    %18 = arith.addf %9, %17 : vector<40x128xf32>
    %19 = arith.negf %18 : vector<40x128xf32>
    %20 = math.exp %19 : vector<40x128xf32>
    %cst_9 = arith.constant 1.000000e+00 : f32
    %21 = vector.broadcast %cst_9 : f32 to vector<40x128xf32>
    %22 = arith.addf %21, %20 : vector<40x128xf32>
    %23 = arith.divf %21, %22 : vector<40x128xf32>
    %24 = vector.extract_strided_slice %16 {offsets = [40, 0], sizes = [40, 128], strides = [1, 1]} : vector<120x128xf32> to vector<40x128xf32>
    %25 = arith.addf %10, %24 : vector<40x128xf32>
    %26 = arith.negf %25 : vector<40x128xf32>
    %27 = math.exp %26 : vector<40x128xf32>
    %cst_10 = arith.constant 1.000000e+00 : f32
    %28 = vector.broadcast %cst_10 : f32 to vector<40x128xf32>
    %29 = arith.addf %28, %27 : vector<40x128xf32>
    %30 = arith.divf %28, %29 : vector<40x128xf32>
    %31 = vector.extract_strided_slice %16 {offsets = [80, 0], sizes = [40, 128], strides = [1, 1]} : vector<120x128xf32> to vector<40x128xf32>
    %32 = arith.addf %31, %14 : vector<40x128xf32>
    %33 = arith.mulf %23, %32 : vector<40x128xf32>
    %34 = arith.addf %11, %33 : vector<40x128xf32>
    %35 = math.tanh %34 : vector<40x128xf32>
    %36 = arith.subf %15, %35 : vector<40x128xf32>
    %37 = arith.mulf %30, %36 : vector<40x128xf32>
    %38 = arith.addf %35, %37 : vector<40x128xf32>
    %c1_i32 = arith.constant 1 : i32
    %cst_11 = arith.constant dense<0.000000e+00> : vector<120x128xf32>
    %39 = tpu.matmul %1, %38, %cst_11 {dimension_numbers = #tpu.dot_dimension_numbers<[1], [0], [0], [1], [0, 0, 1, 1], [], []>} : vector<120x40xf32>, vector<40x128xf32>, vector<120x128xf32> -> vector<120x128xf32>
    %40 = vector.extract_strided_slice %39 {offsets = [0, 0], sizes = [40, 128], strides = [1, 1]} : vector<120x128xf32> to vector<40x128xf32>
    %41 = arith.addf %9, %40 : vector<40x128xf32>
    %42 = arith.negf %41 : vector<40x128xf32>
    %43 = math.exp %42 : vector<40x128xf32>
    %cst_12 = arith.constant 1.000000e+00 : f32
    %44 = vector.broadcast %cst_12 : f32 to vector<40x128xf32>
    %45 = arith.addf %44, %43 : vector<40x128xf32>
    %46 = arith.divf %44, %45 : vector<40x128xf32>
    %47 = vector.extract_strided_slice %39 {offsets = [40, 0], sizes = [40, 128], strides = [1, 1]} : vector<120x128xf32> to vector<40x128xf32>
    %48 = arith.addf %10, %47 : vector<40x128xf32>
    %49 = arith.negf %48 : vector<40x128xf32>
    %50 = math.exp %49 : vector<40x128xf32>
    %cst_13 = arith.constant 1.000000e+00 : f32
    %51 = vector.broadcast %cst_13 : f32 to vector<40x128xf32>
    %52 = arith.addf %51, %50 : vector<40x128xf32>
    %53 = arith.divf %51, %52 : vector<40x128xf32>
    %54 = vector.extract_strided_slice %39 {offsets = [80, 0], sizes = [40, 128], strides = [1, 1]} : vector<120x128xf32> to vector<40x128xf32>
    %55 = arith.addf %54, %14 : vector<40x128xf32>
    %56 = arith.mulf %46, %55 : vector<40x128xf32>
    %57 = arith.addf %11, %56 : vector<40x128xf32>
    %58 = math.tanh %57 : vector<40x128xf32>
    %59 = arith.subf %38, %58 : vector<40x128xf32>
    %60 = arith.mulf %53, %59 : vector<40x128xf32>
    %61 = arith.addf %58, %60 : vector<40x128xf32>
    %c2_i32 = arith.constant 2 : i32
    %cst_14 = arith.constant dense<0.000000e+00> : vector<120x128xf32>
    %62 = tpu.matmul %1, %61, %cst_14 {dimension_numbers = #tpu.dot_dimension_numbers<[1], [0], [0], [1], [0, 0, 1, 1], [], []>} : vector<120x40xf32>, vector<40x128xf32>, vector<120x128xf32> -> vector<120x128xf32>
    %63 = vector.extract_strided_slice %62 {offsets = [0, 0], sizes = [40, 128], strides = [1, 1]} : vector<120x128xf32> to vector<40x128xf32>
    %64 = arith.addf %9, %63 : vector<40x128xf32>
    %65 = arith.negf %64 : vector<40x128xf32>
    %66 = math.exp %65 : vector<40x128xf32>
    %cst_15 = arith.constant 1.000000e+00 : f32
    %67 = vector.broadcast %cst_15 : f32 to vector<40x128xf32>
    %68 = arith.addf %67, %66 : vector<40x128xf32>
    %69 = arith.divf %67, %68 : vector<40x128xf32>
    %70 = vector.extract_strided_slice %62 {offsets = [40, 0], sizes = [40, 128], strides = [1, 1]} : vector<120x128xf32> to vector<40x128xf32>
    %71 = arith.addf %10, %70 : vector<40x128xf32>
    %72 = arith.negf %71 : vector<40x128xf32>
    %73 = math.exp %72 : vector<40x128xf32>
    %cst_16 = arith.constant 1.000000e+00 : f32
    %74 = vector.broadcast %cst_16 : f32 to vector<40x128xf32>
    %75 = arith.addf %74, %73 : vector<40x128xf32>
    %76 = arith.divf %74, %75 : vector<40x128xf32>
    %77 = vector.extract_strided_slice %62 {offsets = [80, 0], sizes = [40, 128], strides = [1, 1]} : vector<120x128xf32> to vector<40x128xf32>
    %78 = arith.addf %77, %14 : vector<40x128xf32>
    %79 = arith.mulf %69, %78 : vector<40x128xf32>
    %80 = arith.addf %11, %79 : vector<40x128xf32>
    %81 = math.tanh %80 : vector<40x128xf32>
    %82 = arith.subf %61, %81 : vector<40x128xf32>
    %83 = arith.mulf %76, %82 : vector<40x128xf32>
    %84 = arith.addf %81, %83 : vector<40x128xf32>
    %c3_i32 = arith.constant 3 : i32
    %cst_17 = arith.constant dense<0.000000e+00> : vector<120x128xf32>
    %85 = tpu.matmul %1, %84, %cst_17 {dimension_numbers = #tpu.dot_dimension_numbers<[1], [0], [0], [1], [0, 0, 1, 1], [], []>} : vector<120x40xf32>, vector<40x128xf32>, vector<120x128xf32> -> vector<120x128xf32>
    %86 = vector.extract_strided_slice %85 {offsets = [0, 0], sizes = [40, 128], strides = [1, 1]} : vector<120x128xf32> to vector<40x128xf32>
    %87 = arith.addf %9, %86 : vector<40x128xf32>
    %88 = arith.negf %87 : vector<40x128xf32>
    %89 = math.exp %88 : vector<40x128xf32>
    %cst_18 = arith.constant 1.000000e+00 : f32
    %90 = vector.broadcast %cst_18 : f32 to vector<40x128xf32>
    %91 = arith.addf %90, %89 : vector<40x128xf32>
    %92 = arith.divf %90, %91 : vector<40x128xf32>
    %93 = vector.extract_strided_slice %85 {offsets = [40, 0], sizes = [40, 128], strides = [1, 1]} : vector<120x128xf32> to vector<40x128xf32>
    %94 = arith.addf %10, %93 : vector<40x128xf32>
    %95 = arith.negf %94 : vector<40x128xf32>
    %96 = math.exp %95 : vector<40x128xf32>
    %cst_19 = arith.constant 1.000000e+00 : f32
    %97 = vector.broadcast %cst_19 : f32 to vector<40x128xf32>
    %98 = arith.addf %97, %96 : vector<40x128xf32>
    %99 = arith.divf %97, %98 : vector<40x128xf32>
    %100 = vector.extract_strided_slice %85 {offsets = [80, 0], sizes = [40, 128], strides = [1, 1]} : vector<120x128xf32> to vector<40x128xf32>
    %101 = arith.addf %100, %14 : vector<40x128xf32>
    %102 = arith.mulf %92, %101 : vector<40x128xf32>
    %103 = arith.addf %11, %102 : vector<40x128xf32>
    %104 = math.tanh %103 : vector<40x128xf32>
    %105 = arith.subf %84, %104 : vector<40x128xf32>
    %106 = arith.mulf %99, %105 : vector<40x128xf32>
    %107 = arith.addf %104, %106 : vector<40x128xf32>
    %c4_i32 = arith.constant 4 : i32
    %cst_20 = arith.constant dense<0.000000e+00> : vector<120x128xf32>
    %108 = tpu.matmul %1, %107, %cst_20 {dimension_numbers = #tpu.dot_dimension_numbers<[1], [0], [0], [1], [0, 0, 1, 1], [], []>} : vector<120x40xf32>, vector<40x128xf32>, vector<120x128xf32> -> vector<120x128xf32>
    %109 = vector.extract_strided_slice %108 {offsets = [0, 0], sizes = [40, 128], strides = [1, 1]} : vector<120x128xf32> to vector<40x128xf32>
    %110 = arith.addf %9, %109 : vector<40x128xf32>
    %111 = arith.negf %110 : vector<40x128xf32>
    %112 = math.exp %111 : vector<40x128xf32>
    %cst_21 = arith.constant 1.000000e+00 : f32
    %113 = vector.broadcast %cst_21 : f32 to vector<40x128xf32>
    %114 = arith.addf %113, %112 : vector<40x128xf32>
    %115 = arith.divf %113, %114 : vector<40x128xf32>
    %116 = vector.extract_strided_slice %108 {offsets = [40, 0], sizes = [40, 128], strides = [1, 1]} : vector<120x128xf32> to vector<40x128xf32>
    %117 = arith.addf %10, %116 : vector<40x128xf32>
    %118 = arith.negf %117 : vector<40x128xf32>
    %119 = math.exp %118 : vector<40x128xf32>
    %cst_22 = arith.constant 1.000000e+00 : f32
    %120 = vector.broadcast %cst_22 : f32 to vector<40x128xf32>
    %121 = arith.addf %120, %119 : vector<40x128xf32>
    %122 = arith.divf %120, %121 : vector<40x128xf32>
    %123 = vector.extract_strided_slice %108 {offsets = [80, 0], sizes = [40, 128], strides = [1, 1]} : vector<120x128xf32> to vector<40x128xf32>
    %124 = arith.addf %123, %14 : vector<40x128xf32>
    %125 = arith.mulf %115, %124 : vector<40x128xf32>
    %126 = arith.addf %11, %125 : vector<40x128xf32>
    %127 = math.tanh %126 : vector<40x128xf32>
    %128 = arith.subf %107, %127 : vector<40x128xf32>
    %129 = arith.mulf %122, %128 : vector<40x128xf32>
    %130 = arith.addf %127, %129 : vector<40x128xf32>
    %c5_i32 = arith.constant 5 : i32
    %cst_23 = arith.constant dense<0.000000e+00> : vector<120x128xf32>
    %131 = tpu.matmul %1, %130, %cst_23 {dimension_numbers = #tpu.dot_dimension_numbers<[1], [0], [0], [1], [0, 0, 1, 1], [], []>} : vector<120x40xf32>, vector<40x128xf32>, vector<120x128xf32> -> vector<120x128xf32>
    %132 = vector.extract_strided_slice %131 {offsets = [0, 0], sizes = [40, 128], strides = [1, 1]} : vector<120x128xf32> to vector<40x128xf32>
    %133 = arith.addf %9, %132 : vector<40x128xf32>
    %134 = arith.negf %133 : vector<40x128xf32>
    %135 = math.exp %134 : vector<40x128xf32>
    %cst_24 = arith.constant 1.000000e+00 : f32
    %136 = vector.broadcast %cst_24 : f32 to vector<40x128xf32>
    %137 = arith.addf %136, %135 : vector<40x128xf32>
    %138 = arith.divf %136, %137 : vector<40x128xf32>
    %139 = vector.extract_strided_slice %131 {offsets = [40, 0], sizes = [40, 128], strides = [1, 1]} : vector<120x128xf32> to vector<40x128xf32>
    %140 = arith.addf %10, %139 : vector<40x128xf32>
    %141 = arith.negf %140 : vector<40x128xf32>
    %142 = math.exp %141 : vector<40x128xf32>
    %cst_25 = arith.constant 1.000000e+00 : f32
    %143 = vector.broadcast %cst_25 : f32 to vector<40x128xf32>
    %144 = arith.addf %143, %142 : vector<40x128xf32>
    %145 = arith.divf %143, %144 : vector<40x128xf32>
    %146 = vector.extract_strided_slice %131 {offsets = [80, 0], sizes = [40, 128], strides = [1, 1]} : vector<120x128xf32> to vector<40x128xf32>
    %147 = arith.addf %146, %14 : vector<40x128xf32>
    %148 = arith.mulf %138, %147 : vector<40x128xf32>
    %149 = arith.addf %11, %148 : vector<40x128xf32>
    %150 = math.tanh %149 : vector<40x128xf32>
    %151 = arith.subf %130, %150 : vector<40x128xf32>
    %152 = arith.mulf %145, %151 : vector<40x128xf32>
    %153 = arith.addf %150, %152 : vector<40x128xf32>
    %c6_i32 = arith.constant 6 : i32
    %cst_26 = arith.constant dense<0.000000e+00> : vector<120x128xf32>
    %154 = tpu.matmul %1, %153, %cst_26 {dimension_numbers = #tpu.dot_dimension_numbers<[1], [0], [0], [1], [0, 0, 1, 1], [], []>} : vector<120x40xf32>, vector<40x128xf32>, vector<120x128xf32> -> vector<120x128xf32>
    %155 = vector.extract_strided_slice %154 {offsets = [0, 0], sizes = [40, 128], strides = [1, 1]} : vector<120x128xf32> to vector<40x128xf32>
    %156 = arith.addf %9, %155 : vector<40x128xf32>
    %157 = arith.negf %156 : vector<40x128xf32>
    %158 = math.exp %157 : vector<40x128xf32>
    %cst_27 = arith.constant 1.000000e+00 : f32
    %159 = vector.broadcast %cst_27 : f32 to vector<40x128xf32>
    %160 = arith.addf %159, %158 : vector<40x128xf32>
    %161 = arith.divf %159, %160 : vector<40x128xf32>
    %162 = vector.extract_strided_slice %154 {offsets = [40, 0], sizes = [40, 128], strides = [1, 1]} : vector<120x128xf32> to vector<40x128xf32>
    %163 = arith.addf %10, %162 : vector<40x128xf32>
    %164 = arith.negf %163 : vector<40x128xf32>
    %165 = math.exp %164 : vector<40x128xf32>
    %cst_28 = arith.constant 1.000000e+00 : f32
    %166 = vector.broadcast %cst_28 : f32 to vector<40x128xf32>
    %167 = arith.addf %166, %165 : vector<40x128xf32>
    %168 = arith.divf %166, %167 : vector<40x128xf32>
    %169 = vector.extract_strided_slice %154 {offsets = [80, 0], sizes = [40, 128], strides = [1, 1]} : vector<120x128xf32> to vector<40x128xf32>
    %170 = arith.addf %169, %14 : vector<40x128xf32>
    %171 = arith.mulf %161, %170 : vector<40x128xf32>
    %172 = arith.addf %11, %171 : vector<40x128xf32>
    %173 = math.tanh %172 : vector<40x128xf32>
    %174 = arith.subf %153, %173 : vector<40x128xf32>
    %175 = arith.mulf %168, %174 : vector<40x128xf32>
    %176 = arith.addf %173, %175 : vector<40x128xf32>
    %c7_i32 = arith.constant 7 : i32
    %cst_29 = arith.constant dense<0.000000e+00> : vector<120x128xf32>
    %177 = tpu.matmul %1, %176, %cst_29 {dimension_numbers = #tpu.dot_dimension_numbers<[1], [0], [0], [1], [0, 0, 1, 1], [], []>} : vector<120x40xf32>, vector<40x128xf32>, vector<120x128xf32> -> vector<120x128xf32>
    %178 = vector.extract_strided_slice %177 {offsets = [0, 0], sizes = [40, 128], strides = [1, 1]} : vector<120x128xf32> to vector<40x128xf32>
    %179 = arith.addf %9, %178 : vector<40x128xf32>
    %180 = arith.negf %179 : vector<40x128xf32>
    %181 = math.exp %180 : vector<40x128xf32>
    %cst_30 = arith.constant 1.000000e+00 : f32
    %182 = vector.broadcast %cst_30 : f32 to vector<40x128xf32>
    %183 = arith.addf %182, %181 : vector<40x128xf32>
    %184 = arith.divf %182, %183 : vector<40x128xf32>
    %185 = vector.extract_strided_slice %177 {offsets = [40, 0], sizes = [40, 128], strides = [1, 1]} : vector<120x128xf32> to vector<40x128xf32>
    %186 = arith.addf %10, %185 : vector<40x128xf32>
    %187 = arith.negf %186 : vector<40x128xf32>
    %188 = math.exp %187 : vector<40x128xf32>
    %cst_31 = arith.constant 1.000000e+00 : f32
    %189 = vector.broadcast %cst_31 : f32 to vector<40x128xf32>
    %190 = arith.addf %189, %188 : vector<40x128xf32>
    %191 = arith.divf %189, %190 : vector<40x128xf32>
    %192 = vector.extract_strided_slice %177 {offsets = [80, 0], sizes = [40, 128], strides = [1, 1]} : vector<120x128xf32> to vector<40x128xf32>
    %193 = arith.addf %192, %14 : vector<40x128xf32>
    %194 = arith.mulf %184, %193 : vector<40x128xf32>
    %195 = arith.addf %11, %194 : vector<40x128xf32>
    %196 = math.tanh %195 : vector<40x128xf32>
    %197 = arith.subf %176, %196 : vector<40x128xf32>
    %198 = arith.mulf %191, %197 : vector<40x128xf32>
    %199 = arith.addf %196, %198 : vector<40x128xf32>
    %c0_32 = arith.constant 0 : index
    %c0_33 = arith.constant 0 : index
    %200 = vector.load %arg5[%c0_32, %c0_33] : memref<8x40xf32, #tpu.memory_space<vmem>>, vector<8x40xf32>
    %cst_34 = arith.constant dense<0.000000e+00> : vector<8x128xf32>
    %201 = tpu.matmul %200, %199, %cst_34 {dimension_numbers = #tpu.dot_dimension_numbers<[1], [0], [0], [1], [0, 0, 1, 1], [], []>} : vector<8x40xf32>, vector<40x128xf32>, vector<8x128xf32> -> vector<8x128xf32>
    %c0_35 = arith.constant 0 : index
    %c0_36 = arith.constant 0 : index
    %202 = vector.load %arg6[%c0_35, %c0_36] : memref<8x128xf32, #tpu.memory_space<vmem>>, vector<8x128xf32>
    tpu.vector_store %arg6[%c0_35, %c0_36], %201 {strides = array<i32>} : memref<8x128xf32, #tpu.memory_space<vmem>>, vector<8x128xf32>,
    return
  }
  func.func @transform_0(%arg0: i32) -> (i32, i32) {
    %c0_i32 = arith.constant 0 : i32
    %c0_i32_0 = arith.constant 0 : i32
    return %c0_i32, %arg0 : i32, i32
  }
  func.func @transform_1(%arg0: i32) -> (i32, i32) {
    %c0_i32 = arith.constant 0 : i32
    %c0_i32_0 = arith.constant 0 : i32
    %c0_i32_1 = arith.constant 0 : i32
    return %c0_i32, %c0_i32_0 : i32, i32
  }
  func.func @transform_2(%arg0: i32) -> (i32, i32) {
    %c0_i32 = arith.constant 0 : i32
    %c0_i32_0 = arith.constant 0 : i32
    %c0_i32_1 = arith.constant 0 : i32
    return %c0_i32, %c0_i32_0 : i32, i32
  }
  func.func @transform_3(%arg0: i32) -> (i32, i32) {
    %c0_i32 = arith.constant 0 : i32
    %c0_i32_0 = arith.constant 0 : i32
    %c0_i32_1 = arith.constant 0 : i32
    return %c0_i32, %c0_i32_0 : i32, i32
  }
  func.func @transform_4(%arg0: i32) -> (i32, i32) {
    %c0_i32 = arith.constant 0 : i32
    %c0_i32_0 = arith.constant 0 : i32
    %c0_i32_1 = arith.constant 0 : i32
    return %c0_i32, %c0_i32_0 : i32, i32
  }
  func.func @transform_5(%arg0: i32) -> (i32, i32) {
    %c0_i32 = arith.constant 0 : i32
    %c0_i32_0 = arith.constant 0 : i32
    return %c0_i32, %arg0 : i32, i32
  }
}

</mosaic_0001>

<bundles_post_ra>
// kernel: tpu_custom_call.1
= control target key start
LH: loop header
LB: loop body
LE: loop exit
PB: predicated region body
PF: predicated region fallthrough
CT: control target
= control target key end

     0   :  { %vm147_vm0 = vcmask 64512   ;;  %v3799_v2 = vmov 0.0   ;;  %vm3800_vm1 = vmmov 0   ;;  %v3801_v7 = vmov 0   ;;  %s5120_s0 = inlined_call_operand.vmem [shape: f32[8,128], index: 0, kind: input, shape index: {}]   ;;  %s5121_s1 = inlined_call_operand.vmem [shape: f32[120,8], index: 1, kind: input, shape index: {}]   ;;  %s5122_s2 = inlined_call_operand.vmem [shape: f32[120,40], index: 2, kind: input, shape index: {}]   ;;  %s5123_s3 = inlined_call_operand.vmem [shape: f32[160,1], index: 3, kind: input, shape index: {}]   ;;  %s5124_s4 = inlined_call_operand.vmem [shape: f32[8,40], index: 4, kind: input, shape index: {}]   ;;  %s5125_s5 = inlined_call_operand.hbm [shape: f32[8,128], index: 5, kind: output, shape index: {}]  }
   0x1   :  { %v21_v0 = vld [vmem:[%s5120_s0] sm:$0xff]  ;;  %3339 = vmatprep.subr.mxu1 %v3799_v2  ;;  %2873 = vmatprep.mubr.msk.f32.mxu1 %vm3800_vm1, %v3799_v2  ;;  %v66_v4 = vld [vmem:[%s5121_s1 + $0x48] sm:$0xff]  ;;  %v39_v5 = vld [vmem:[%s5123_s3 + $0x10] sm:$0xff] }
   0x2   :  { %v65_v1 = vld [vmem:[%s5121_s1 + $0x40] sm:$0xff]  ;;  %3340 = vmatpush3.msra.mxu1 %v21_v0  ;;  %2847 = vmatprep.subr.mxu0 %v3799_v2  ;;  %v58_v6 = vld [vmem:[%s5121_s1 + $0x8] sm:$0xff]  ;;  %v67_v8 = vld [vmem:[%s5121_s1 + $0x50] sm:$0xff] }
   0x3   :  { %v57_v3 = vld [vmem:[%s5121_s1] sm:$0xff]  ;;  %2874 = vmatmul.mubr.msk.f32.vlgmr.msra.gmra.mxu1 %vm147_vm0, %v65_v1  ;;  %2848 = vmatpush3.msra.mxu0 %v21_v0  ;;  %v38_v9 = vld [vmem:[%s5123_s3 + $0x8] sm:$0xff]  ;;  %v59_v11 = vld [vmem:[%s5121_s1 + $0x10] sm:$0xff] }
   0x4   :  { %2876 = vmatprep.mubr.msk.f32.mxu1 %vm3800_vm1, %v3799_v2  ;;  %2849 = vmatprep.mubr.msk.f32.mxu0 %vm3800_vm1, %v3799_v2  ;;  %v41_v10 = vld [vmem:[%s5123_s3 + $0x20] sm:$0xff]  ;;  %v40_v12 = vld [vmem:[%s5123_s3 + $0x18] sm:$0xff]  ;;  %v46_v14 = vld [vmem:[%s5123_s3 + $0x48] sm:$0xff] }
   0x5   :  { %2850 = vmatmul.mubr.msk.f32.vlgmr.msra.gmra.mxu0 %vm147_vm0, %v57_v3  ;;  %2894 = vmatprep.subr.mxu1 %v3799_v2  ;;  %v68_v13 = vld [vmem:[%s5121_s1 + $0x58] sm:$0xff]  ;;  %v37_v16 = vld [vmem:[%s5123_s3] sm:$0xff] }
   0x6   :  { %2852 = vmatprep.mubr.msk.f32.mxu0 %vm3800_vm1, %v3799_v2  ;;  %2895 = vmatpush3.msra.mxu1 %v3799_v2  ;;  %v60_v15 = vld [vmem:[%s5121_s1 + $0x18] sm:$0xff]  ;;  %v69_v17 = vld [vmem:[%s5121_s1 + $0x60] sm:$0xff] }
   0x7   :  { %2877 = vmatmul.mubr.msk.f32.gmra.mxu1 %vm147_vm0, %v66_v4  ;;  %3346 = vset.pattern.permute.xlu1 %v3801_v7  ;;  %v44_v18 = vld [vmem:[%s5123_s3 + $0x38] sm:$0xff] }
   0x8   :  { %2879 = vmatprep.mubr.msk.f32.mxu1 %vm3800_vm1, %v3799_v2  ;;  %84 = vperm.xlu1 %3346, %v39_v5  }
   0x9   :  { %2853 = vmatmul.mubr.msk.f32.gmra.mxu0 %vm147_vm0, %v58_v6  ;;  %3345 = vset.pattern.permute.xlu0 %v3801_v7 }
   0xa   :  { %2855 = vmatprep.mubr.msk.f32.mxu0 %vm3800_vm1, %v3799_v2  ;;  %94 = vperm.xlu0 %3345, %v41_v10  }
   0xb   :  { %2880 = vmatmul.mubr.msk.f32.gmra.mxu1 %vm147_vm0, %v67_v8  ;;  %2941 = vmatprep.subr.mxu0 %v3799_v2 }
   0xc   :  { %2882 = vmatprep.mubr.msk.f32.mxu1 %vm3800_vm1, %v3799_v2  ;;  %79 = vperm.xlu1 %3346, %v38_v9  }
   0xd   :  { %2856 = vmatmul.mubr.msk.f32.gmra.mxu0 %vm147_vm0, %v59_v11  ;;  %2996 = vmatprep.subr.mxu1 %v3799_v2 }
   0xe   :  { %2858 = vmatprep.mubr.msk.f32.mxu0 %vm3800_vm1, %v3799_v2  ;;  %89 = vperm.xlu0 %3345, %v40_v12  }
   0xf   :  { %2883 = vmatmul.mubr.msk.f32.gmra.mxu1 %vm147_vm0, %v68_v13 }
  0x10   :  { %2885 = vmatprep.mubr.msk.f32.mxu1 %vm3800_vm1, %v3799_v2  ;;  %119 = vperm.xlu1 %3346, %v46_v14  }
  0x11   :  { %2859 = vmatmul.mubr.msk.f32.gmra.mxu0 %vm147_vm0, %v60_v15 }
  0x12   :  { %10 = vsyncpa [#allocation3], 0  ;;  %2861 = vmatprep.mubr.msk.f32.mxu0 %vm3800_vm1, %v3799_v2  ;;  %v61_v19 = vld [vmem:[%s5121_s1 + $0x20] sm:$0xff]  ;;  %74 = vperm.xlu0 %3345, %v37_v16   ;;  %v70_v21 = vld [vmem:[%s5121_s1 + $0x68] sm:$0xff]  ;;  %vm358_vm2 = vcmask 326656   ;;  %s3802_s18 = smov [#allocation2]  }
  0x13   :  { %2886 = vmatmul.mubr.msk.f32.gmra.mxu1 %vm147_vm0, %v69_v17  ;;  %v45_v20 = vld [vmem:[%s5123_s3 + $0x40] sm:$0xff]  ;;  %v42_v22 = vld [vmem:[%s5123_s3 + $0x28] sm:$0xff]  ;;  %v43_v24 = vld [vmem:[%s5123_s3 + $0x30] sm:$0xff]  ;;  %s2445_s19 = sshll.u32 %s3802_s18, 4  ;;  %s2446_s19 = int_to_ptr.vmem [resolvable:$true] %s2445_s19 }
  0x14   :  { %2888 = vmatprep.mubr.msk.f32.mxu1 %vm3800_vm1, %v3799_v2  ;;  %109 = vperm.xlu1 %3346, %v44_v18   ;;  %v62_v23 = vld [vmem:[%s5121_s1 + $0x28] sm:$0xff]  ;;  %v71_v25 = vld [vmem:[%s5121_s1 + $0x70] sm:$0xff]  ;;  %v56_v28 = vld [vmem:[%s5123_s3 + $0x98] sm:$0xff]  ;;  %s3777_s20 = scalar_lea.vmem %s2446_s19, 128  ;;  %p3782_p1 = scmp.lt.s32.totalorder %s2446_s19, %s2446_s19 }
  0x15   :  { %2862 = vmatmul.mubr.msk.f32.gmra.mxu0 %vm147_vm0, %v61_v19  ;;  %v51_v26 = vld [vmem:[%s5123_s3 + $0x70] sm:$0xff]  ;;  %v3966_v29 = vld [vmem:[%s5122_s2] sm:$0xff]  ;;  %v50_v30 = vld [vmem:[%s5123_s3 + $0x68] sm:$0xff]  ;;  %p3778_p0 = scmp.ne.s32.totalorder %s2446_s19, %s3777_s20  ;;  %p3783_p2 = scmp.lt.s32.totalorder %s3777_s20, %s3777_s20 }
  0x16   :  { %2864 = vmatprep.mubr.msk.f32.mxu0 %vm3800_vm1, %v3799_v2  ;;  %114 = vperm.xlu0 %3345, %v45_v20   ;;  %v63_v27 = vld [vmem:[%s5121_s1 + $0x30] sm:$0xff]  ;;  %v64_v31 = vld [vmem:[%s5121_s1 + $0x38] sm:$0xff]  ;;  %v3987_v33 = vld [vmem:[%s5122_s2 + $0x8] sm:$0xff] }
  0x17   :  { %2889 = vmatmul.mubr.msk.f32.gmra.mxu1 %vm147_vm0, %v70_v21  ;;  %v55_v32 = vld [vmem:[%s5123_s3 + $0x90] sm:$0xff]  ;;  %v49_v34 = vld [vmem:[%s5123_s3 + $0x60] sm:$0xff]  ;;  %v54_v35 = vld [vmem:[%s5123_s3 + $0x88] sm:$0xff]  ;;  %p3784_p3 = por %p3783_p2, %p3782_p1 }
  0x18   :  { %2891 = vmatprep.mubr.msk.f32.mxu1 %vm3800_vm1, %v3799_v2  ;;  %99 = vperm.xlu1 %3346, %v42_v22   ;;  %v4005_v36 = vld [vmem:[%s5122_s2 + $0x10] sm:$0xff]  ;;  %v48_v37 = vld [vmem:[%s5123_s3 + $0x58] sm:$0xff]  ;;  %v53_v38 = vld [vmem:[%s5123_s3 + $0x80] sm:$0xff] }
  0x19   :  { %2865 = vmatmul.mubr.msk.f32.gmra.mxu0 %vm147_vm0, %v62_v23  ;;  %v4020_v39 = vld [vmem:[%s5122_s2 + $0x18] sm:$0xff]  ;;  %v47_v40 = vld [vmem:[%s5123_s3 + $0x50] sm:$0xff]  ;;  %v4035_v42 = vld [vmem:[%s5122_s2 + $0x20] sm:$0xff]  ;;  %p3785_p4 = pnand %p3784_p3, %p3778_p0 }
  0x1a   :  { %2867 = vmatprep.mubr.msk.f32.mxu0 %vm3800_vm1, %v3799_v2  ;;  %104 = vperm.xlu0 %3345, %v43_v24   ;;  %v52_v41 = vld [vmem:[%s5123_s3 + $0x78] sm:$0xff]  ;;  %v4044_v43 = vld [vmem:[%s5122_s2 + $0x28] sm:$0xff]  ;;  %v4053_v44 = vld [vmem:[%s5122_s2 + $0x30] sm:$0xff] }
  0x1b   :  { %2892 = vmatmul.mubr.msk.f32.gmra.mxu1 %vm147_vm0, %v71_v25  ;;  %v4062_v45 = vld [vmem:[%s5122_s2 + $0x38] sm:$0xff]  ;;  %v4071_v46 = vld [vmem:[%s5122_s2 + $0x40] sm:$0xff]  ;;  %v4080_v47 = vld [vmem:[%s5122_s2 + $0x48] sm:$0xff] }
  0x1c   :  { %2896 = vmatprep.mubr.msk.f32.mxu1 %vm3800_vm1, %v3799_v2  ;;  %144 = vperm.xlu1 %3346, %v51_v26   ;;  %v4089_v48 = vld [vmem:[%s5122_s2 + $0x50] sm:$0xff]  ;;  %v4098_v49 = vld [vmem:[%s5122_s2 + $0x58] sm:$0xff]  ;;  %v4107_v50 = vld [vmem:[%s5122_s2 + $0x60] sm:$0xff] }
  0x1d   :  { %2868 = vmatmul.mubr.msk.f32.gmra.mxu0 %vm147_vm0, %v63_v27  ;;  %v4116_v51 = vld [vmem:[%s5122_s2 + $0x68] sm:$0xff]  ;;  %v4125_v52 = vld [vmem:[%s5122_s2 + $0x70] sm:$0xff] }
  0x1e   :  { %2870 = vmatprep.mubr.msk.f32.mxu0 %vm3800_vm1, %v3799_v2  ;;  %355 = vperm.xlu0 %3345, %v56_v28  }
  0x1f   :  { %2897 = vmatmul.mubr.msk.f32.vlgmr.msra.gmra.mxu1 %vm358_vm2, %v3966_v29 }
  0x20   :  { %2899 = vmatprep.mubr.msk.f32.mxu1 %vm3800_vm1, %v3799_v2  ;;  %139 = vperm.xlu1 %3346, %v50_v30  }
  0x21   :  { %2871 = vmatmul.mubr.msk.f32.gmra.mxu0 %vm147_vm0, %v64_v31 }
  0x22   :  { %350 = vperm.xlu0 %3345, %v55_v32   ;;  %2951 = vmatprep.mubr.msk.f32.mxu0 %vm3800_vm1, %v3799_v2 }
  0x23   :  { %2900 = vmatmul.mubr.msk.f32.gmra.mxu1 %vm358_vm2, %v3987_v33 }
  0x24   :  { %2902 = vmatprep.mubr.msk.f32.mxu1 %vm3800_vm1, %v3799_v2  ;;  %134 = vperm.xlu1 %3346, %v49_v34  }
  0x26   :  { %345 = vperm.xlu0 %3345, %v54_v35  }
  0x27   :  { %2903 = vmatmul.mubr.msk.f32.gmra.mxu1 %vm358_vm2, %v4005_v36 }
  0x28   :  { %2905 = vmatprep.mubr.msk.f32.mxu1 %vm3800_vm1, %v3799_v2  ;;  %129 = vperm.xlu1 %3346, %v48_v37  }
  0x2a   :  { %340 = vperm.xlu0 %3345, %v53_v38  }
  0x2b   :  { %2906 = vmatmul.mubr.msk.f32.gmra.mxu1 %vm358_vm2, %v4020_v39 }
  0x2c   :  { %2908 = vmatprep.mubr.msk.f32.mxu1 %vm3800_vm1, %v3799_v2  ;;  %124 = vperm.xlu1 %3346, %v47_v40  }
  0x2e   :  { %335 = vperm.xlu0 %3345, %v52_v41  }
  0x2f   :  { %2909 = vmatmul.mubr.msk.f32.gmra.mxu1 %vm358_vm2, %v4035_v42 }
  0x30   :  { %2911 = vmatprep.mubr.msk.f32.mxu1 %vm3800_vm1, %v3799_v2 }
  0x33   :  { %2912 = vmatmul.mubr.msk.f32.gmra.mxu1 %vm358_vm2, %v4044_v43 }
  0x34   :  { %2914 = vmatprep.mubr.msk.f32.mxu1 %vm3800_vm1, %v3799_v2 }
  0x37   :  { %2915 = vmatmul.mubr.msk.f32.gmra.mxu1 %vm358_vm2, %v4053_v44 }
  0x38   :  { %2917 = vmatprep.mubr.msk.f32.mxu1 %vm3800_vm1, %v3799_v2 }
  0x3b   :  { %2918 = vmatmul.mubr.msk.f32.gmra.mxu1 %vm358_vm2, %v4062_v45 }
  0x3c   :  { %2920 = vmatprep.mubr.msk.f32.mxu1 %vm3800_vm1, %v3799_v2 }
  0x3f   :  { %2921 = vmatmul.mubr.msk.f32.gmra.mxu1 %vm358_vm2, %v4071_v46 }
  0x40   :  { %2923 = vmatprep.mubr.msk.f32.mxu1 %vm3800_vm1, %v3799_v2 }
  0x43   :  { %2924 = vmatmul.mubr.msk.f32.gmra.mxu1 %vm358_vm2, %v4080_v47 }
  0x44   :  { %2926 = vmatprep.mubr.msk.f32.mxu1 %vm3800_vm1, %v3799_v2 }
  0x47   :  { %2927 = vmatmul.mubr.msk.f32.gmra.mxu1 %vm358_vm2, %v4089_v48 }
  0x48   :  { %2929 = vmatprep.mubr.msk.f32.mxu1 %vm3800_vm1, %v3799_v2 }
  0x4b   :  { %2930 = vmatmul.mubr.msk.f32.gmra.mxu1 %vm358_vm2, %v4098_v49 }
  0x4c   :  { %2932 = vmatprep.mubr.msk.f32.mxu1 %vm3800_vm1, %v3799_v2 }
  0x4f   :  { %2933 = vmatmul.mubr.msk.f32.gmra.mxu1 %vm358_vm2, %v4107_v50 }
  0x50   :  { %2935 = vmatprep.mubr.msk.f32.mxu1 %vm3800_vm1, %v3799_v2 }
  0x53   :  { %2936 = vmatmul.mubr.msk.f32.gmra.mxu1 %vm358_vm2, %v4116_v51 }
  0x54   :  { %2938 = vmatprep.mubr.msk.f32.mxu1 %vm3800_vm1, %v3799_v2 }
  0x57   :  { %2939 = vmatmul.mubr.msk.f32.gmra.mxu1 %vm358_vm2, %v4125_v52 }
  0x58   :  { %3006 = vmatprep.mubr.msk.f32.mxu1 %vm3800_vm1, %v3799_v2 }
  0x83   :  { %v85_v16 = vpop.permute.xlu1 %84 }
  0x85   :  { %v95_v11 = vpop.permute.xlu0 %94 }
  0x87   :  { %v80_v24 = vpop.permute.xlu1 %79 }
  0x89   :  { %v90_v19 = vpop.permute.xlu0 %89 }
  0x8b   :  { %v120_v35 = vpop.permute.xlu1 %119 }
  0x8d   :  { %v75_v27 = vpop.permute.xlu0 %74 }
  0xc3   :  { %v4131_v53 = vpop.f32.mrf.mxu1 }
  0xc5   :  { %v2875_v54 = vpop.f32.mrf.mxu1  ;;  %v259_v55 = vpop.f32.mrf.mxu0 }
  0xc6   :  { %v4151_v28 = vadd.f32 %v259_v55, %v75_v27 }
  0xc7   :  { %v4133_v56 = vpop.f32.mrf.mxu1  ;;  %v2851_v57 = vpop.f32.mrf.mxu0 }
  0xc9   :  { %v2878_v58 = vpop.f32.mrf.mxu1  ;;  %v264_v59 = vpop.f32.mrf.mxu0 }
  0xca   :  { %v4155_v32 = vadd.f32 %v264_v59, %v80_v24  ;;  %v115_v58 = vpop.permute.xlu0 %114 }
  0xcb   :  { %v4135_v60 = vpop.f32.mrf.mxu1  ;;  %v2854_v61 = vpop.f32.mrf.mxu0 }
  0xcd   :  { %v2881_v62 = vpop.f32.mrf.mxu1  ;;  %v269_v63 = vpop.f32.mrf.mxu0 }
  0xce   :  { %v4153_v31 = vadd.f32 %v269_v63, %v85_v16  ;;  %v110_v63 = vpop.permute.xlu1 %109 }
  0xcf   :  { %v4137_v0 = vpop.f32.mrf.mxu1  ;;  %v2857_v1 = vpop.f32.mrf.mxu0 }
  0xd1   :  { %v2884_v3 = vpop.f32.mrf.mxu1  ;;  %v274_v4 = vpop.f32.mrf.mxu0 }
  0xd2   :  { %v4157_v37 = vadd.f32 %v274_v4, %v90_v19 }
  0xd3   :  { %v4139_v5 = vpop.f32.mrf.mxu1  ;;  %v2860_v6 = vpop.f32.mrf.mxu0 }
  0xd4   :  { %v105_v6 = vpop.permute.xlu0 %104 }
  0xd5   :  { %v2887_v7 = vpop.f32.mrf.mxu1  ;;  %v279_v8 = vpop.f32.mrf.mxu0 }
  0xd6   :  { %v4162_v55 = vadd.f32 %v279_v8, %v95_v11  ;;  %v100_v8 = vpop.permute.xlu1 %99 }
  0xd7   :  { %v4141_v9 = vpop.f32.mrf.mxu1  ;;  %v2863_v10 = vpop.f32.mrf.mxu0 }
  0xd9   :  { %v2890_v12 = vpop.f32.mrf.mxu1  ;;  %v4143_v13 = vpop.f32.mrf.mxu0 }
  0xdb   :  { %v4145_v14 = vpop.f32.mrf.mxu1  ;;  %v2866_v15 = vpop.f32.mrf.mxu0 }
  0xdd   :  { %v2893_v17 = vpop.f32.mrf.mxu1  ;;  %v4147_v18 = vpop.f32.mrf.mxu0 }
  0xde   :  { %v4166_v17 = vpop.permute.xlu0 %355 }
  0xdf   :  { %v470_v20 = vpop.f32.mrf.mxu1  ;;  %v2869_v21 = vpop.f32.mrf.mxu0 }
  0xe0   :  { %v544_v38 = vadd.f32 %v470_v20, %v4151_v28  ;;  %v4168_v21 = vpop.permute.xlu1 %144 }
  0xe1   :  { %v2898_v22 = vpop.f32.mrf.mxu1  ;;  %v4149_v23 = vpop.f32.mrf.mxu0 }
  0xe2   :  { %v2483_v62 = vmul.f32 -1.442695, %v544_v38  ;;  %v4170_v24 = vpop.permute.xlu0 %350 }
  0xe3   :  { %v475_v25 = vpop.f32.mrf.mxu1  ;;  %v2872_v26 = vpop.f32.mrf.mxu0 }
  0xe4   :  { %v545_v54 = vadd.f32 %v475_v25, %v4155_v32  ;;  %3347 = vpow2.f32 %v2483_v62  ;;  %v4172_v38 = vpop.permute.xlu1 %139 }
  0xe5   :  { %v2901_v30 = vpop.f32.mrf.mxu1 }
  0xe6   :  { %v2484_v3 = vmul.f32 -1.442695, %v545_v54 }
  0xe7   :  { %v480_v34 = vpop.f32.mrf.mxu1 }
  0xe8   :  { %v546_v41 = vadd.f32 %v480_v34, %v4153_v31 }
  0xe9   :  { %v2904_v40 = vpop.f32.mrf.mxu1 }
  0xea   :  { %v2485_v1 = vmul.f32 -1.442695, %v546_v41  ;;  %v4175_v40 = vadd.f32 %v4131_v53, %v115_v58  ;;  %v4188_v58 = vadd.f32 %v4143_v13, %v100_v8 }
  0xeb   :  { %v485_v57 = vpop.f32.mrf.mxu1 }
  0xec   :  { %v547_v61 = vadd.f32 %v485_v57, %v4157_v37  ;;  %3349 = vpow2.f32 %v2485_v1 }
  0xed   :  { %v2907_v59 = vpop.f32.mrf.mxu1  ;;  %3351 = vpow2.f32 %v2484_v3 }
  0xee   :  { %v2486_v7 = vmul.f32 -1.442695, %v547_v61  ;;  %v4178_v61 = vadd.f32 %v4133_v56, %v120_v35  ;;  %v4180_v59 = vpop.permute.xlu0 %345  ;;  %v135_v35 = vpop.permute.xlu1 %134 }
  0xef   :  { %v490_v4 = vpop.f32.mrf.mxu1 }
  0xf0   :  { %v548_v10 = vadd.f32 %v490_v4, %v4162_v55  ;;  %3353 = vpow2.f32 %v2486_v7 }
  0xf1   :  { %v2910_v12 = vpop.f32.mrf.mxu1  ;;  %v3348_v26 = vpop.eup %3347 }
  0xf2   :  { %v2487_v15 = vmul.f32 -1.442695, %v548_v10  ;;  %v564_v54 = vadd.f32 1.0, %v3348_v26  ;;  %v4184_v12 = vadd.f32 %v4149_v23, %v110_v63  ;;  %v4194_v23 = vpop.permute.xlu0 %340 }
  0xf3   :  { %v495_v16 = vpop.f32.mrf.mxu1 }
  0xf4   :  { %3355 = vpow2.f32 %v2487_v15  ;;  %v4191_v15 = vadd.f32 %v4147_v18, %v105_v6  ;;  %v579_v8 = vadd.f32 %v495_v16, %v4188_v58  ;;  %v130_v6 = vpop.permute.xlu1 %129 }
  0xf5   :  { %v2913_v11 = vpop.f32.mrf.mxu1  ;;  %3357 = vrcp.f32 %v564_v54 }
  0xf6   :  { %v2488_v54 = vmul.f32 -1.442695, %v579_v8  ;;  %v4212_v8 = vadd.f32 %v4141_v9, %v4172_v38  ;;  %v4224_v38 = vadd.f32 %v4145_v14, %v4168_v21 }
  0xf7   :  { %v500_v19 = vpop.f32.mrf.mxu1 }
  0xf8   :  { %v580_v63 = vadd.f32 %v500_v19, %v4191_v15 }
  0xf9   :  { %v2916_v20 = vpop.f32.mrf.mxu1  ;;  %v3350_v27 = vpop.eup %3349 }
  0xfa   :  { %v3352_v34 = vpop.eup %3351  ;;  %v566_v62 = vadd.f32 1.0, %v3350_v27 }
  0xfb   :  { %v505_v22 = vpop.f32.mrf.mxu1  ;;  %v565_v3 = vadd.f32 1.0, %v3352_v34  ;;  %v2489_v34 = vmul.f32 -1.442695, %v580_v63 }
  0xfc   :  { %3359 = vrcp.f32 %v566_v62  ;;  %v581_v11 = vadd.f32 %v505_v22, %v4184_v12 }
  0xfd   :  { %v2919_v25 = vpop.f32.mrf.mxu1  ;;  %v3354_v41 = vpop.eup %3353  ;;  %3361 = vrcp.f32 %v565_v3 }
  0xfe   :  { %v567_v10 = vadd.f32 1.0, %v3354_v41  ;;  %v4198_v41 = vpop.permute.xlu0 %335 }
  0xff   :  { %v510_v30 = vpop.f32.mrf.mxu1 }
 0x100   :  { %v582_v1 = vadd.f32 %v510_v30, %v4175_v40  ;;  %3363 = vrcp.f32 %v567_v10  ;;  %v2490_v30 = vmul.f32 -1.442695, %v581_v11 }
 0x101   :  { %v2922_v57 = vpop.f32.mrf.mxu1  ;;  %v3356_v7 = vpop.eup %3355 }
 0x102   :  { %v2491_v20 = vmul.f32 -1.442695, %v582_v1  ;;  %v568_v25 = vadd.f32 1.0, %v3356_v7  ;;  %v3358_v3 = vpop.eup %3357 }
 0x103   :  { %v515_v4 = vpop.f32.mrf.mxu1 }
 0x104   :  { %v583_v53 = vadd.f32 %v515_v4, %v4178_v61  ;;  %3365 = vpow2.f32 %v2491_v20  ;;  %v125_v4 = vpop.permute.xlu1 %124 }
 0x105   :  { %v2925_v56 = vpop.f32.mrf.mxu1  ;;  %3367 = vrcp.f32 %v568_v25 }
 0x106   :  { %v2492_v27 = vmul.f32 -1.442695, %v583_v53 }
 0x107   :  { %v520_v26 = vpop.f32.mrf.mxu1 }
 0x108   :  { %3369 = vpow2.f32 %v2492_v27  ;;  %v614_v57 = vadd.f32 %v520_v26, %v4198_v41  ;;  %v4205_v26 = vadd.f32 %v4135_v60, %v125_v4 }
 0x109   :  { %v2928_v13 = vpop.f32.mrf.mxu1  ;;  %3371 = vpow2.f32 %v2490_v30  ;;  %v3360_v7 = vpop.eup %3359 }
 0x10a   :  { %3373 = vpow2.f32 %v2489_v34  ;;  %v619_v10 = vmul.f32 %v3358_v3, %v614_v57  ;;  %v3362_v56 = vpop.eup %3361  ;;  %v4208_v13 = vadd.f32 %v4139_v5, %v135_v35  ;;  %v4215_v34 = vadd.f32 %v4137_v0, %v130_v6 }
 0x10b   :  { %v525_v18 = vpop.f32.mrf.mxu1  ;;  %3375 = vpow2.f32 %v2488_v54 }
 0x10c   :  { %v615_v16 = vadd.f32 %v525_v18, %v4194_v23 }
 0x10d   :  { %v2931_v22 = vpop.f32.mrf.mxu1  ;;  %v3364_v25 = vpop.eup %3363 }
 0x10e   :  { %v620_v63 = vmul.f32 %v3362_v56, %v615_v16  ;;  %v624_v22 = vadd.f32 %v619_v10, %v4205_v26 }
 0x10f   :  { %v530_v62 = vpop.f32.mrf.mxu1 }
 0x110   :  { %v616_v19 = vadd.f32 %v530_v62, %v4180_v59 }
 0x111   :  { %v2934_v1 = vpop.f32.mrf.mxu1  ;;  %v3366_v18 = vpop.eup %3365 }
 0x112   :  { %v621_v11 = vmul.f32 %v3360_v7, %v616_v19  ;;  %v3368_v57 = vpop.eup %3367  ;;  %v625_v19 = vadd.f32 %v620_v63, %v4215_v34  ;;  %v602_v16 = vadd.f32 1.0, %v3366_v18 }
 0x113   :  { %v535_v53 = vpop.f32.mrf.mxu1 }
 0x114   :  { %v617_v20 = vadd.f32 %v535_v53, %v4170_v24  ;;  %v626_v60 = vadd.f32 %v621_v11, %v4208_v13 }
 0x115   :  { %v2937_v27 = vpop.f32.mrf.mxu1  ;;  %v3370_v35 = vpop.eup %3369 }
 0x116   :  { %v622_v30 = vmul.f32 %v3364_v25, %v617_v20  ;;  %v3372_v6 = vpop.eup %3371  ;;  %v603_v1 = vadd.f32 1.0, %v3370_v35 }
 0x117   :  { %v540_v54 = vpop.f32.mrf.mxu1  ;;  %v3374_v4 = vpop.eup %3373  ;;  %v601_v7 = vadd.f32 1.0, %v3372_v6 }
 0x118   :  { %v627_v62 = vadd.f32 %v622_v30, %v4212_v8  ;;  %v618_v5 = vadd.f32 %v540_v54, %v4166_v17  ;;  %v3376_v10 = vpop.eup %3375  ;;  %v600_v53 = vadd.f32 1.0, %v3374_v4 }
 0x119   :  { %v2940_v9 = vpop.f32.mrf.mxu1  ;;  %v599_v56 = vadd.f32 1.0, %v3376_v10 }
 0x11a   :  { %3377 = vtanh.f32 %v627_v62  ;;  %v623_v0 = vmul.f32 %v3368_v57, %v618_v5 }
 0x11b   :  { %3379 = vtanh.f32 %v624_v22 }
 0x11c   :  { %3381 = vtanh.f32 %v626_v60  ;;  %v628_v3 = vadd.f32 %v623_v0, %v4224_v38 }
 0x11d   :  { %3383 = vtanh.f32 %v625_v19 }
 0x11e   :  { %3385 = vtanh.f32 %v628_v3 }
 0x11f   :  { %3387 = vrcp.f32 %v602_v16 }
 0x120   :  { %3389 = vrcp.f32 %v603_v1 }
 0x121   :  { %3391 = vrcp.f32 %v601_v7 }
 0x122   :  { %3393 = vrcp.f32 %v600_v53 }
 0x123   :  { %3395 = vrcp.f32 %v599_v56 }
 0x127   :  { %v3378_v14 = vpop.eup %3377 }
 0x128   :  { %v3380_v21 = vpop.eup %3379  ;;  %v637_v25 = vsub.f32 0.0, %v3378_v14 }
 0x129   :  { %v3382_v11 = vpop.eup %3381  ;;  %v634_v19 = vsub.f32 0.0, %v3380_v21 }
 0x12a   :  { %v3384_v20 = vpop.eup %3383  ;;  %v636_v18 = vsub.f32 0.0, %v3382_v11 }
 0x12b   :  { %v3386_v63 = vpop.eup %3385  ;;  %v635_v60 = vsub.f32 0.0, %v3384_v20 }
 0x12c   :  { %v3388_v27 = vpop.eup %3387  ;;  %v638_v30 = vsub.f32 0.0, %v3386_v63 }
 0x12d   :  { %v3390_v22 = vpop.eup %3389  ;;  %v642_v57 = vmul.f32 %v3388_v27, %v637_v25 }
 0x12e   :  { %v643_v54 = vmul.f32 %v3390_v22, %v638_v30  ;;  %v3392_v62 = vpop.eup %3391 }
 0x12f   :  { %v641_v35 = vmul.f32 %v3392_v62, %v636_v18  ;;  %v3394_v9 = vpop.eup %3393  ;;  %v4230_v0 = vadd.f32 %v3378_v14, %v642_v57 }
 0x130   :  { %v4227_v5 = vadd.f32 %v3386_v63, %v643_v54  ;;  %v640_v6 = vmul.f32 %v3394_v9, %v635_v60  ;;  %v3396_v16 = vpop.eup %3395 }
 0x131   :  { %v4234_v1 = vadd.f32 %v3382_v11, %v641_v35  ;;  %v639_v3 = vmul.f32 %v3396_v16, %v634_v19 }
 0x132   :  { %2942 = vmatpush3.msra.mxu0 %v4227_v5  ;;  %v4238_v4 = vadd.f32 %v3384_v20, %v640_v6 }
 0x133   :  { %2943 = vmatprep.subr.mxu0 %v3799_v2  ;;  %v4242_v7 = vadd.f32 %v3380_v21, %v639_v3 }
 0x134   :  { %2944 = vmatpush3.msra.mxu0 %v4230_v0 }
 0x135   :  { %2945 = vmatprep.subr.mxu0 %v3799_v2 }
 0x136   :  { %2946 = vmatpush3.msra.mxu0 %v4234_v1 }
 0x137   :  { %2947 = vmatprep.subr.mxu0 %v3799_v2 }
 0x138   :  { %2948 = vmatpush3.msra.mxu0 %v4238_v4 }
 0x139   :  { %2949 = vmatprep.subr.mxu0 %v3799_v2 }
 0x13a   :  { %2950 = vmatpush3.msra.mxu0 %v4242_v7 }
 0x13b   :  { %2952 = vmatmul.mubr.msk.f32.vlgmr.msra.gmra.mxu0 %vm358_vm2, %v3966_v29  ;;  %3051 = vmatprep.subr.mxu0 %v3799_v2 }
 0x13c   :  { %2954 = vmatprep.mubr.msk.f32.mxu0 %vm3800_vm1, %v3799_v2 }
 0x13f   :  { %2955 = vmatmul.mubr.msk.f32.gmra.mxu0 %vm358_vm2, %v3987_v33 }
 0x140   :  { %2957 = vmatprep.mubr.msk.f32.mxu0 %vm3800_vm1, %v3799_v2 }
 0x143   :  { %2958 = vmatmul.mubr.msk.f32.gmra.mxu0 %vm358_vm2, %v4005_v36 }
 0x144   :  { %2960 = vmatprep.mubr.msk.f32.mxu0 %vm3800_vm1, %v3799_v2 }
 0x147   :  { %2961 = vmatmul.mubr.msk.f32.gmra.mxu0 %vm358_vm2, %v4020_v39 }
 0x148   :  { %2963 = vmatprep.mubr.msk.f32.mxu0 %vm3800_vm1, %v3799_v2 }
 0x14b   :  { %2964 = vmatmul.mubr.msk.f32.gmra.mxu0 %vm358_vm2, %v4035_v42 }
 0x14c   :  { %2966 = vmatprep.mubr.msk.f32.mxu0 %vm3800_vm1, %v3799_v2 }
 0x14f   :  { %2967 = vmatmul.mubr.msk.f32.gmra.mxu0 %vm358_vm2, %v4044_v43 }
 0x150   :  { %2969 = vmatprep.mubr.msk.f32.mxu0 %vm3800_vm1, %v3799_v2 }
 0x153   :  { %2970 = vmatmul.mubr.msk.f32.gmra.mxu0 %vm358_vm2, %v4053_v44 }
 0x154   :  { %2972 = vmatprep.mubr.msk.f32.mxu0 %vm3800_vm1, %v3799_v2 }
 0x157   :  { %2973 = vmatmul.mubr.msk.f32.gmra.mxu0 %vm358_vm2, %v4062_v45 }
 0x158   :  { %2975 = vmatprep.mubr.msk.f32.mxu0 %vm3800_vm1, %v3799_v2 }
 0x15b   :  { %2976 = vmatmul.mubr.msk.f32.gmra.mxu0 %vm358_vm2, %v4071_v46 }
 0x15c   :  { %2978 = vmatprep.mubr.msk.f32.mxu0 %vm3800_vm1, %v3799_v2 }
 0x15f   :  { %2979 = vmatmul.mubr.msk.f32.gmra.mxu0 %vm358_vm2, %v4080_v47 }
 0x160   :  { %2981 = vmatprep.mubr.msk.f32.mxu0 %vm3800_vm1, %v3799_v2 }
 0x163   :  { %2982 = vmatmul.mubr.msk.f32.gmra.mxu0 %vm358_vm2, %v4089_v48 }
 0x164   :  { %2984 = vmatprep.mubr.msk.f32.mxu0 %vm3800_vm1, %v3799_v2 }
 0x167   :  { %2985 = vmatmul.mubr.msk.f32.gmra.mxu0 %vm358_vm2, %v4098_v49 }
 0x168   :  { %2987 = vmatprep.mubr.msk.f32.mxu0 %vm3800_vm1, %v3799_v2 }
 0x16b   :  { %2988 = vmatmul.mubr.msk.f32.gmra.mxu0 %vm358_vm2, %v4107_v50 }
 0x16c   :  { %2990 = vmatprep.mubr.msk.f32.mxu0 %vm3800_vm1, %v3799_v2 }
 0x16f   :  { %2991 = vmatmul.mubr.msk.f32.gmra.mxu0 %vm358_vm2, %v4116_v51 }
 0x170   :  { %2993 = vmatprep.mubr.msk.f32.mxu0 %vm3800_vm1, %v3799_v2 }
 0x173   :  { %2994 = vmatmul.mubr.msk.f32.gmra.mxu0 %vm358_vm2, %v4125_v52 }
 0x174   :  { %3061 = vmatprep.mubr.msk.f32.mxu0 %vm3800_vm1, %v3799_v2 }
 0x1fb   :  { %v715_v10 = vpop.f32.mrf.mxu0 }
 0x1fc   :  { %v789_v11 = vadd.f32 %v715_v10, %v4151_v28 }
 0x1fd   :  { %v2953_v53 = vpop.f32.mrf.mxu0 }
 0x1fe   :  { %v2508_v18 = vmul.f32 -1.442695, %v789_v11 }
 0x1ff   :  { %v720_v56 = vpop.f32.mrf.mxu0 }
 0x200   :  { %v790_v63 = vadd.f32 %v720_v56, %v4155_v32  ;;  %3397 = vpow2.f32 %v2508_v18 }
 0x201   :  { %v2956_v14 = vpop.f32.mrf.mxu0 }
 0x202   :  { %v2509_v57 = vmul.f32 -1.442695, %v790_v63 }
 0x203   :  { %v725_v21 = vpop.f32.mrf.mxu0 }
 0x204   :  { %v791_v25 = vadd.f32 %v725_v21, %v4153_v31 }
 0x205   :  { %v2959_v20 = vpop.f32.mrf.mxu0 }
 0x206   :  { %v2510_v54 = vmul.f32 -1.442695, %v791_v25 }
 0x207   :  { %v730_v27 = vpop.f32.mrf.mxu0 }
 0x208   :  { %v792_v30 = vadd.f32 %v730_v27, %v4157_v37  ;;  %3399 = vpow2.f32 %v2510_v54 }
 0x209   :  { %v2962_v22 = vpop.f32.mrf.mxu0  ;;  %3401 = vpow2.f32 %v2509_v57 }
 0x20a   :  { %v2511_v62 = vmul.f32 -1.442695, %v792_v30 }
 0x20b   :  { %v735_v60 = vpop.f32.mrf.mxu0 }
 0x20c   :  { %v793_v35 = vadd.f32 %v735_v60, %v4162_v55  ;;  %3403 = vpow2.f32 %v2511_v62 }
 0x20d   :  { %v2965_v19 = vpop.f32.mrf.mxu0  ;;  %v3398_v14 = vpop.eup %3397 }
 0x20e   :  { %v2512_v9 = vmul.f32 -1.442695, %v793_v35  ;;  %v809_v63 = vadd.f32 1.0, %v3398_v14 }
 0x20f   :  { %v740_v6 = vpop.f32.mrf.mxu0 }
 0x210   :  { %3405 = vpow2.f32 %v2512_v9 }
 0x211   :  { %v2968_v16 = vpop.f32.mrf.mxu0  ;;  %3407 = vrcp.f32 %v809_v63 }
 0x213   :  { %v745_v3 = vpop.f32.mrf.mxu0 }
 0x215   :  { %v2971_v10 = vpop.f32.mrf.mxu0  ;;  %v3400_v21 = vpop.eup %3399 }
 0x216   :  { %v3402_v20 = vpop.eup %3401  ;;  %v811_v30 = vadd.f32 1.0, %v3400_v21 }
 0x217   :  { %v750_v53 = vpop.f32.mrf.mxu0  ;;  %v810_v22 = vadd.f32 1.0, %v3402_v20 }
 0x218   :  { %3409 = vrcp.f32 %v811_v30  ;;  %v826_v19 = vadd.f32 %v750_v53, %v4184_v12 }
 0x219   :  { %v2974_v56 = vpop.f32.mrf.mxu0  ;;  %v3404_v25 = vpop.eup %3403  ;;  %3411 = vrcp.f32 %v810_v22 }
 0x21a   :  { %v812_v60 = vadd.f32 1.0, %v3404_v25  ;;  %v825_v56 = vadd.f32 %v745_v3, %v4191_v15  ;;  %v2515_v20 = vmul.f32 -1.442695, %v826_v19 }
 0x21b   :  { %v755_v11 = vpop.f32.mrf.mxu0 }
 0x21c   :  { %v827_v18 = vadd.f32 %v755_v11, %v4175_v40  ;;  %3413 = vrcp.f32 %v812_v60  ;;  %v824_v11 = vadd.f32 %v740_v6, %v4188_v58  ;;  %v2514_v63 = vmul.f32 -1.442695, %v825_v56 }
 0x21d   :  { %v2977_v27 = vpop.f32.mrf.mxu0  ;;  %v3406_v57 = vpop.eup %3405 }
 0x21e   :  { %v2516_v9 = vmul.f32 -1.442695, %v827_v18  ;;  %v813_v16 = vadd.f32 1.0, %v3406_v57  ;;  %v2513_v30 = vmul.f32 -1.442695, %v824_v11  ;;  %v3408_v57 = vpop.eup %3407 }
 0x21f   :  { %v760_v54 = vpop.f32.mrf.mxu0 }
 0x220   :  { %v828_v62 = vadd.f32 %v760_v54, %v4178_v61  ;;  %3415 = vpow2.f32 %v2516_v9 }
 0x221   :  { %v2980_v35 = vpop.f32.mrf.mxu0  ;;  %3417 = vrcp.f32 %v813_v16 }
 0x222   :  { %v2517_v14 = vmul.f32 -1.442695, %v828_v62 }
 0x223   :  { %v765_v10 = vpop.f32.mrf.mxu0 }
 0x224   :  { %3419 = vpow2.f32 %v2517_v14  ;;  %v859_v53 = vadd.f32 %v765_v10, %v4198_v41 }
 0x225   :  { %v2983_v21 = vpop.f32.mrf.mxu0  ;;  %3421 = vpow2.f32 %v2515_v20  ;;  %v3410_v6 = vpop.eup %3409 }
 0x226   :  { %3423 = vpow2.f32 %v2514_v63  ;;  %v864_v60 = vmul.f32 %v3408_v57, %v859_v53  ;;  %v3412_v35 = vpop.eup %3411 }
 0x227   :  { %v770_v25 = vpop.f32.mrf.mxu0  ;;  %3425 = vpow2.f32 %v2513_v30 }
 0x228   :  { %v860_v3 = vadd.f32 %v770_v25, %v4194_v23  ;;  %v869_v11 = vadd.f32 %v864_v60, %v4205_v26 }
 0x229   :  { %v2986_v27 = vpop.f32.mrf.mxu0  ;;  %v3414_v16 = vpop.eup %3413 }
 0x22a   :  { %v865_v56 = vmul.f32 %v3412_v35, %v860_v3 }
 0x22b   :  { %v775_v18 = vpop.f32.mrf.mxu0 }
 0x22c   :  { %v861_v22 = vadd.f32 %v775_v18, %v4180_v59  ;;  %v870_v18 = vadd.f32 %v865_v56, %v4215_v34 }
 0x22d   :  { %v2989_v54 = vpop.f32.mrf.mxu0  ;;  %v3416_v21 = vpop.eup %3415 }
 0x22e   :  { %v866_v19 = vmul.f32 %v3410_v6, %v861_v22  ;;  %v3418_v63 = vpop.eup %3417  ;;  %v847_v57 = vadd.f32 1.0, %v3416_v21 }
 0x22f   :  { %v780_v62 = vpop.f32.mrf.mxu0 }
 0x230   :  { %v862_v9 = vadd.f32 %v780_v62, %v4170_v24  ;;  %v871_v25 = vadd.f32 %v866_v19, %v4208_v13 }
 0x231   :  { %v2992_v14 = vpop.f32.mrf.mxu0  ;;  %v3420_v53 = vpop.eup %3419 }
 0x232   :  { %v867_v10 = vmul.f32 %v3414_v16, %v862_v9  ;;  %v3422_v3 = vpop.eup %3421  ;;  %v848_v6 = vadd.f32 1.0, %v3420_v53 }
 0x233   :  { %v785_v20 = vpop.f32.mrf.mxu0  ;;  %v3424_v62 = vpop.eup %3423  ;;  %v846_v35 = vadd.f32 1.0, %v3422_v3 }
 0x234   :  { %v872_v27 = vadd.f32 %v867_v10, %v4212_v8  ;;  %v863_v30 = vadd.f32 %v785_v20, %v4166_v17  ;;  %v3426_v19 = vpop.eup %3425  ;;  %v845_v9 = vadd.f32 1.0, %v3424_v62 }
 0x235   :  { %v2995_v22 = vpop.f32.mrf.mxu0  ;;  %v844_v16 = vadd.f32 1.0, %v3426_v19 }
 0x236   :  { %3427 = vtanh.f32 %v872_v27  ;;  %v868_v54 = vmul.f32 %v3418_v63, %v863_v30 }
 0x237   :  { %3429 = vtanh.f32 %v869_v11 }
 0x238   :  { %3431 = vtanh.f32 %v871_v25  ;;  %v873_v60 = vadd.f32 %v868_v54, %v4224_v38 }
 0x239   :  { %3433 = vtanh.f32 %v870_v18 }
 0x23a   :  { %3435 = vtanh.f32 %v873_v60 }
 0x23b   :  { %3437 = vrcp.f32 %v847_v57 }
 0x23c   :  { %3439 = vrcp.f32 %v848_v6 }
 0x23d   :  { %3441 = vrcp.f32 %v846_v35 }
 0x23e   :  { %3443 = vrcp.f32 %v845_v9 }
 0x23f   :  { %3445 = vrcp.f32 %v844_v16 }
 0x243   :  { %v3428_v56 = vpop.eup %3427 }
 0x244   :  { %v3430_v14 = vpop.eup %3429  ;;  %v882_v11 = vsub.f32 %v4230_v0, %v3428_v56 }
 0x245   :  { %v3432_v10 = vpop.eup %3431  ;;  %v879_v6 = vsub.f32 %v4242_v7, %v3430_v14 }
 0x246   :  { %v3434_v21 = vpop.eup %3433  ;;  %v881_v27 = vsub.f32 %v4234_v1, %v3432_v10 }
 0x247   :  { %v3436_v20 = vpop.eup %3435  ;;  %v880_v22 = vsub.f32 %v4238_v4, %v3434_v21 }
 0x248   :  { %v3438_v63 = vpop.eup %3437  ;;  %v883_v25 = vsub.f32 %v4227_v5, %v3436_v20 }
 0x249   :  { %v3440_v30 = vpop.eup %3439  ;;  %v887_v18 = vmul.f32 %v3438_v63, %v882_v11 }
 0x24a   :  { %v888_v53 = vmul.f32 %v3440_v30, %v883_v25  ;;  %v3442_v54 = vpop.eup %3441 }
 0x24b   :  { %v886_v57 = vmul.f32 %v3442_v54, %v881_v27  ;;  %v3444_v60 = vpop.eup %3443  ;;  %v4335_v0 = vadd.f32 %v3428_v56, %v887_v18 }
 0x24c   :  { %v4331_v3 = vadd.f32 %v3436_v20, %v888_v53  ;;  %v885_v62 = vmul.f32 %v3444_v60, %v880_v22  ;;  %v3446_v5 = vpop.eup %3445 }
 0x24d   :  { %v4339_v1 = vadd.f32 %v3432_v10, %v886_v57  ;;  %v884_v4 = vmul.f32 %v3446_v5, %v879_v6 }
 0x24e   :  { %2997 = vmatpush3.msra.mxu1 %v4331_v3  ;;  %v4343_v35 = vadd.f32 %v3434_v21, %v885_v62 }
 0x24f   :  { %2998 = vmatprep.subr.mxu1 %v3799_v2  ;;  %v4347_v7 = vadd.f32 %v3430_v14, %v884_v4 }
 0x250   :  { %2999 = vmatpush3.msra.mxu1 %v4335_v0 }
 0x251   :  { %3000 = vmatprep.subr.mxu1 %v3799_v2 }
 0x252   :  { %3001 = vmatpush3.msra.mxu1 %v4339_v1 }
 0x253   :  { %3002 = vmatprep.subr.mxu1 %v3799_v2 }
 0x254   :  { %3003 = vmatpush3.msra.mxu1 %v4343_v35 }
 0x255   :  { %3004 = vmatprep.subr.mxu1 %v3799_v2 }
 0x256   :  { %3005 = vmatpush3.msra.mxu1 %v4347_v7 }
 0x257   :  { %3007 = vmatmul.mubr.msk.f32.vlgmr.msra.gmra.mxu1 %vm358_vm2, %v3966_v29  ;;  %3106 = vmatprep.subr.mxu1 %v3799_v2 }
 0x258   :  { %3009 = vmatprep.mubr.msk.f32.mxu1 %vm3800_vm1, %v3799_v2 }
 0x25b   :  { %3010 = vmatmul.mubr.msk.f32.gmra.mxu1 %vm358_vm2, %v3987_v33 }
 0x25c   :  { %3012 = vmatprep.mubr.msk.f32.mxu1 %vm3800_vm1, %v3799_v2 }
 0x25f   :  { %3013 = vmatmul.mubr.msk.f32.gmra.mxu1 %vm358_vm2, %v4005_v36 }
 0x260   :  { %3015 = vmatprep.mubr.msk.f32.mxu1 %vm3800_vm1, %v3799_v2 }
 0x263   :  { %3016 = vmatmul.mubr.msk.f32.gmra.mxu1 %vm358_vm2, %v4020_v39 }
 0x264   :  { %3018 = vmatprep.mubr.msk.f32.mxu1 %vm3800_vm1, %v3799_v2 }
 0x267   :  { %3019 = vmatmul.mubr.msk.f32.gmra.mxu1 %vm358_vm2, %v4035_v42 }
 0x268   :  { %3021 = vmatprep.mubr.msk.f32.mxu1 %vm3800_vm1, %v3799_v2 }
 0x26b   :  { %3022 = vmatmul.mubr.msk.f32.gmra.mxu1 %vm358_vm2, %v4044_v43 }
 0x26c   :  { %3024 = vmatprep.mubr.msk.f32.mxu1 %vm3800_vm1, %v3799_v2 }
 0x26f   :  { %3025 = vmatmul.mubr.msk.f32.gmra.mxu1 %vm358_vm2, %v4053_v44 }
 0x270   :  { %3027 = vmatprep.mubr.msk.f32.mxu1 %vm3800_vm1, %v3799_v2 }
 0x273   :  { %3028 = vmatmul.mubr.msk.f32.gmra.mxu1 %vm358_vm2, %v4062_v45 }
 0x274   :  { %3030 = vmatprep.mubr.msk.f32.mxu1 %vm3800_vm1, %v3799_v2 }
 0x277   :  { %3031 = vmatmul.mubr.msk.f32.gmra.mxu1 %vm358_vm2, %v4071_v46 }
 0x278   :  { %3033 = vmatprep.mubr.msk.f32.mxu1 %vm3800_vm1, %v3799_v2 }
 0x27b   :  { %3034 = vmatmul.mubr.msk.f32.gmra.mxu1 %vm358_vm2, %v4080_v47 }
 0x27c   :  { %3036 = vmatprep.mubr.msk.f32.mxu1 %vm3800_vm1, %v3799_v2 }
 0x27f   :  { %3037 = vmatmul.mubr.msk.f32.gmra.mxu1 %vm358_vm2, %v4089_v48 }
 0x280   :  { %3039 = vmatprep.mubr.msk.f32.mxu1 %vm3800_vm1, %v3799_v2 }
 0x283   :  { %3040 = vmatmul.mubr.msk.f32.gmra.mxu1 %vm358_vm2, %v4098_v49 }
 0x284   :  { %3042 = vmatprep.mubr.msk.f32.mxu1 %vm3800_vm1, %v3799_v2 }
 0x287   :  { %3043 = vmatmul.mubr.msk.f32.gmra.mxu1 %vm358_vm2, %v4107_v50 }
 0x288   :  { %3045 = vmatprep.mubr.msk.f32.mxu1 %vm3800_vm1, %v3799_v2 }
 0x28b   :  { %3046 = vmatmul.mubr.msk.f32.gmra.mxu1 %vm358_vm2, %v4116_v51 }
 0x28c   :  { %3048 = vmatprep.mubr.msk.f32.mxu1 %vm3800_vm1, %v3799_v2 }
 0x28f   :  { %3049 = vmatmul.mubr.msk.f32.gmra.mxu1 %vm358_vm2, %v4125_v52 }
 0x290   :  { %3116 = vmatprep.mubr.msk.f32.mxu1 %vm3800_vm1, %v3799_v2 }
 0x317   :  { %v960_v29 = vpop.f32.mrf.mxu1 }
 0x318   :  { %v1034_v43 = vadd.f32 %v960_v29, %v4151_v28 }
 0x319   :  { %v3008_v33 = vpop.f32.mrf.mxu1 }
 0x31a   :  { %v2533_v49 = vmul.f32 -1.442695, %v1034_v43 }
 0x31b   :  { %v965_v36 = vpop.f32.mrf.mxu1 }
 0x31c   :  { %v1035_v46 = vadd.f32 %v965_v36, %v4155_v32  ;;  %3447 = vpow2.f32 %v2533_v49 }
 0x31d   :  { %v3011_v39 = vpop.f32.mrf.mxu1 }
 0x31e   :  { %v2534_v52 = vmul.f32 -1.442695, %v1035_v46 }
 0x31f   :  { %v970_v42 = vpop.f32.mrf.mxu1 }
 0x320   :  { %v1036_v45 = vadd.f32 %v970_v42, %v4153_v31 }
 0x321   :  { %v3014_v44 = vpop.f32.mrf.mxu1 }
 0x322   :  { %v2535_v51 = vmul.f32 -1.442695, %v1036_v45 }
 0x323   :  { %v975_v47 = vpop.f32.mrf.mxu1 }
 0x324   :  { %v1037_v48 = vadd.f32 %v975_v47, %v4157_v37  ;;  %3449 = vpow2.f32 %v2535_v51 }
 0x325   :  { %v3017_v50 = vpop.f32.mrf.mxu1  ;;  %3451 = vpow2.f32 %v2534_v52 }
 0x326   :  { %v2536_v9 = vmul.f32 -1.442695, %v1037_v48 }
 0x327   :  { %v980_v19 = vpop.f32.mrf.mxu1 }
 0x328   :  { %v1038_v16 = vadd.f32 %v980_v19, %v4162_v55  ;;  %3453 = vpow2.f32 %v2536_v9 }
 0x329   :  { %v3020_v56 = vpop.f32.mrf.mxu1  ;;  %v3448_v27 = vpop.eup %3447 }
 0x32a   :  { %v2537_v14 = vmul.f32 -1.442695, %v1038_v16  ;;  %v1054_v54 = vadd.f32 1.0, %v3448_v27 }
 0x32b   :  { %v985_v10 = vpop.f32.mrf.mxu1 }
 0x32c   :  { %3455 = vpow2.f32 %v2537_v14  ;;  %v1069_v48 = vadd.f32 %v985_v10, %v4188_v58 }
 0x32d   :  { %v3023_v21 = vpop.f32.mrf.mxu1  ;;  %3457 = vrcp.f32 %v1054_v54 }
 0x32e   :  { %v2538_v19 = vmul.f32 -1.442695, %v1069_v48 }
 0x32f   :  { %v990_v11 = vpop.f32.mrf.mxu1 }
 0x330   :  { %v1070_v45 = vadd.f32 %v990_v11, %v4191_v15 }
 0x331   :  { %v3026_v20 = vpop.f32.mrf.mxu1  ;;  %v3450_v30 = vpop.eup %3449 }
 0x332   :  { %v3452_v18 = vpop.eup %3451  ;;  %v1056_v6 = vadd.f32 1.0, %v3450_v30  ;;  %v2539_v51 = vmul.f32 -1.442695, %v1070_v45 }
 0x333   :  { %v995_v63 = vpop.f32.mrf.mxu1  ;;  %v1055_v62 = vadd.f32 1.0, %v3452_v18 }
 0x334   :  { %3459 = vrcp.f32 %v1056_v6  ;;  %v1071_v39 = vadd.f32 %v995_v63, %v4184_v12 }
 0x335   :  { %v3029_v25 = vpop.f32.mrf.mxu1  ;;  %v3454_v22 = vpop.eup %3453  ;;  %3461 = vrcp.f32 %v1055_v62 }
 0x336   :  { %v1057_v29 = vadd.f32 1.0, %v3454_v22  ;;  %v2540_v49 = vmul.f32 -1.442695, %v1071_v39 }
 0x337   :  { %v1000_v53 = vpop.f32.mrf.mxu1 }
 0x338   :  { %v1072_v60 = vadd.f32 %v1000_v53, %v4175_v40  ;;  %3463 = vrcp.f32 %v1057_v29 }
 0x339   :  { %v3032_v57 = vpop.f32.mrf.mxu1  ;;  %v3456_v4 = vpop.eup %3455 }
 0x33a   :  { %v2541_v42 = vmul.f32 -1.442695, %v1072_v60  ;;  %v1058_v43 = vadd.f32 1.0, %v3456_v4  ;;  %v3458_v11 = vpop.eup %3457 }
 0x33b   :  { %v1005_v5 = vpop.f32.mrf.mxu1 }
 0x33c   :  { %v1073_v33 = vadd.f32 %v1005_v5, %v4178_v61  ;;  %3465 = vpow2.f32 %v2541_v42 }
 0x33d   :  { %v3035_v36 = vpop.f32.mrf.mxu1  ;;  %3467 = vrcp.f32 %v1058_v43 }
 0x33e   :  { %v2542_v46 = vmul.f32 -1.442695, %v1073_v33 }
 0x33f   :  { %v1010_v44 = vpop.f32.mrf.mxu1 }
 0x340   :  { %3469 = vpow2.f32 %v2542_v46  ;;  %v1104_v9 = vadd.f32 %v1010_v44, %v4198_v41 }
 0x341   :  { %v3038_v47 = vpop.f32.mrf.mxu1  ;;  %3471 = vpow2.f32 %v2540_v49  ;;  %v3460_v10 = vpop.eup %3459 }
 0x342   :  { %3473 = vpow2.f32 %v2539_v51  ;;  %v1109_v20 = vmul.f32 %v3458_v11, %v1104_v9  ;;  %v3462_v25 = vpop.eup %3461 }
 0x343   :  { %v1015_v50 = vpop.f32.mrf.mxu1  ;;  %3475 = vpow2.f32 %v2538_v19 }
 0x344   :  { %v1105_v14 = vadd.f32 %v1015_v50, %v4194_v23  ;;  %v1114_v6 = vadd.f32 %v1109_v20, %v4205_v26 }
 0x345   :  { %v3041_v52 = vpop.f32.mrf.mxu1  ;;  %v3464_v53 = vpop.eup %3463 }
 0x346   :  { %v1110_v18 = vmul.f32 %v3462_v25, %v1105_v14 }
 0x347   :  { %v1020_v16 = vpop.f32.mrf.mxu1 }
 0x348   :  { %v1106_v56 = vadd.f32 %v1020_v16, %v4180_v59  ;;  %v1115_v36 = vadd.f32 %v1110_v18, %v4215_v34 }
 0x349   :  { %v3044_v21 = vpop.f32.mrf.mxu1  ;;  %v3466_v57 = vpop.eup %3465 }
 0x34a   :  { %v1111_v27 = vmul.f32 %v3460_v10, %v1106_v56  ;;  %v3468_v62 = vpop.eup %3467  ;;  %v1092_v44 = vadd.f32 1.0, %v3466_v57 }
 0x34b   :  { %v1025_v63 = vpop.f32.mrf.mxu1 }
 0x34c   :  { %v1107_v30 = vadd.f32 %v1025_v63, %v4170_v24  ;;  %v1116_v5 = vadd.f32 %v1111_v27, %v4208_v13 }
 0x34d   :  { %v3047_v22 = vpop.f32.mrf.mxu1  ;;  %v3470_v33 = vpop.eup %3469 }
 0x34e   :  { %v1112_v54 = vmul.f32 %v3464_v53, %v1107_v30  ;;  %v3472_v43 = vpop.eup %3471  ;;  %v1093_v45 = vadd.f32 1.0, %v3470_v33  ;;  %v4505_v33 = vld [vmem:[%s5122_s2 + $0x28] sm:$0xff] }
 0x34f   :  { %v1030_v60 = vpop.f32.mrf.mxu1  ;;  %v3474_v47 = vpop.eup %3473  ;;  %v1091_v48 = vadd.f32 1.0, %v3472_v43  ;;  %v4541_v43 = vld [vmem:[%s5122_s2 + $0x48] sm:$0xff] }
 0x350   :  { %v1117_v4 = vadd.f32 %v1112_v54, %v4212_v8  ;;  %v1108_v29 = vadd.f32 %v1030_v60, %v4166_v17  ;;  %v3476_v49 = vpop.eup %3475  ;;  %v1090_v50 = vadd.f32 1.0, %v3474_v47  ;;  %v4459_v60 = vld [vmem:[%s5122_s2] sm:$0xff]  ;;  %v4577_v47 = vld [vmem:[%s5122_s2 + $0x68] sm:$0xff] }
 0x351   :  { %v3050_v39 = vpop.f32.mrf.mxu1  ;;  %v1089_v51 = vadd.f32 1.0, %v3476_v49 }
 0x352   :  { %3477 = vtanh.f32 %v1117_v4  ;;  %v1113_v42 = vmul.f32 %v3468_v62, %v1108_v29  ;;  %v4469_v62 = vld [vmem:[%s5122_s2 + $0x8] sm:$0xff]  ;;  %v4487_v4 = vld [vmem:[%s5122_s2 + $0x18] sm:$0xff]  ;;  %v4496_v29 = vld [vmem:[%s5122_s2 + $0x20] sm:$0xff] }
 0x353   :  { %3479 = vtanh.f32 %v1114_v6  ;;  %v4523_v39 = vld [vmem:[%s5122_s2 + $0x38] sm:$0xff] }
 0x354   :  { %3481 = vtanh.f32 %v1116_v5  ;;  %v1118_v46 = vadd.f32 %v1113_v42, %v4224_v38  ;;  %v4478_v5 = vld [vmem:[%s5122_s2 + $0x10] sm:$0xff]  ;;  %v4532_v42 = vld [vmem:[%s5122_s2 + $0x40] sm:$0xff] }
 0x355   :  { %3483 = vtanh.f32 %v1115_v36  ;;  %v4514_v36 = vld [vmem:[%s5122_s2 + $0x30] sm:$0xff] }
 0x356   :  { %3485 = vtanh.f32 %v1118_v46  ;;  %v4568_v46 = vld [vmem:[%s5122_s2 + $0x60] sm:$0xff] }
 0x357   :  { %3487 = vrcp.f32 %v1092_v44  ;;  %v4550_v44 = vld [vmem:[%s5122_s2 + $0x50] sm:$0xff] }
 0x358   :  { %3489 = vrcp.f32 %v1093_v45  ;;  %v4559_v45 = vld [vmem:[%s5122_s2 + $0x58] sm:$0xff] }
 0x359   :  { %3491 = vrcp.f32 %v1091_v48  ;;  %v4586_v48 = vld [vmem:[%s5122_s2 + $0x70] sm:$0xff] }
 0x35a   :  { %3493 = vrcp.f32 %v1090_v50 }
 0x35b   :  { %3495 = vrcp.f32 %v1089_v51 }
 0x35f   :  { %v3478_v52 = vpop.eup %3477 }
 0x360   :  { %v3480_v19 = vpop.eup %3479  ;;  %v1127_v56 = vsub.f32 %v4335_v0, %v3478_v52 }
 0x361   :  { %v3482_v9 = vpop.eup %3481  ;;  %v1124_v22 = vsub.f32 %v4347_v7, %v3480_v19 }
 0x362   :  { %v3484_v16 = vpop.eup %3483  ;;  %v1126_v10 = vsub.f32 %v4339_v1, %v3482_v9 }
 0x363   :  { %v3486_v14 = vpop.eup %3485  ;;  %v1125_v27 = vsub.f32 %v4343_v35, %v3484_v16 }
 0x364   :  { %v3488_v21 = vpop.eup %3487  ;;  %v1128_v11 = vsub.f32 %v4331_v3, %v3486_v14 }
 0x365   :  { %v3490_v20 = vpop.eup %3489  ;;  %v1132_v25 = vmul.f32 %v3488_v21, %v1127_v56 }
 0x366   :  { %v1133_v63 = vmul.f32 %v3490_v20, %v1128_v11  ;;  %v3492_v30 = vpop.eup %3491 }
 0x367   :  { %v1131_v18 = vmul.f32 %v3492_v30, %v1126_v10  ;;  %v3494_v54 = vpop.eup %3493  ;;  %v4440_v0 = vadd.f32 %v3478_v52, %v1132_v25 }
 0x368   :  { %v4436_v53 = vadd.f32 %v3486_v14, %v1133_v63  ;;  %v1130_v57 = vmul.f32 %v3494_v54, %v1125_v27  ;;  %v3496_v3 = vpop.eup %3495 }
 0x369   :  { %v4444_v1 = vadd.f32 %v3482_v9, %v1131_v18  ;;  %v1129_v35 = vmul.f32 %v3496_v3, %v1124_v22 }
 0x36a   :  { %3052 = vmatpush3.msra.mxu0 %v4436_v53  ;;  %v4448_v6 = vadd.f32 %v3484_v16, %v1130_v57 }
 0x36b   :  { %3053 = vmatprep.subr.mxu0 %v3799_v2  ;;  %v4452_v7 = vadd.f32 %v3480_v19, %v1129_v35 }
 0x36c   :  { %3054 = vmatpush3.msra.mxu0 %v4440_v0 }
 0x36d   :  { %3055 = vmatprep.subr.mxu0 %v3799_v2 }
 0x36e   :  { %3056 = vmatpush3.msra.mxu0 %v4444_v1 }
 0x36f   :  { %3057 = vmatprep.subr.mxu0 %v3799_v2 }
 0x370   :  { %3058 = vmatpush3.msra.mxu0 %v4448_v6 }
 0x371   :  { %3059 = vmatprep.subr.mxu0 %v3799_v2 }
 0x372   :  { %3060 = vmatpush3.msra.mxu0 %v4452_v7 }
 0x373   :  { %3062 = vmatmul.mubr.msk.f32.vlgmr.msra.gmra.mxu0 %vm358_vm2, %v4459_v60  ;;  %3161 = vmatprep.subr.mxu0 %v3799_v2 }
 0x374   :  { %3064 = vmatprep.mubr.msk.f32.mxu0 %vm3800_vm1, %v3799_v2 }
 0x377   :  { %3065 = vmatmul.mubr.msk.f32.gmra.mxu0 %vm358_vm2, %v4469_v62 }
 0x378   :  { %3067 = vmatprep.mubr.msk.f32.mxu0 %vm3800_vm1, %v3799_v2 }
 0x37b   :  { %3068 = vmatmul.mubr.msk.f32.gmra.mxu0 %vm358_vm2, %v4478_v5 }
 0x37c   :  { %3070 = vmatprep.mubr.msk.f32.mxu0 %vm3800_vm1, %v3799_v2 }
 0x37f   :  { %3071 = vmatmul.mubr.msk.f32.gmra.mxu0 %vm358_vm2, %v4487_v4 }
 0x380   :  { %3073 = vmatprep.mubr.msk.f32.mxu0 %vm3800_vm1, %v3799_v2 }
 0x383   :  { %3074 = vmatmul.mubr.msk.f32.gmra.mxu0 %vm358_vm2, %v4496_v29 }
 0x384   :  { %3076 = vmatprep.mubr.msk.f32.mxu0 %vm3800_vm1, %v3799_v2 }
 0x387   :  { %3077 = vmatmul.mubr.msk.f32.gmra.mxu0 %vm358_vm2, %v4505_v33 }
 0x388   :  { %3079 = vmatprep.mubr.msk.f32.mxu0 %vm3800_vm1, %v3799_v2 }
 0x38b   :  { %3080 = vmatmul.mubr.msk.f32.gmra.mxu0 %vm358_vm2, %v4514_v36 }
 0x38c   :  { %3082 = vmatprep.mubr.msk.f32.mxu0 %vm3800_vm1, %v3799_v2 }
 0x38f   :  { %3083 = vmatmul.mubr.msk.f32.gmra.mxu0 %vm358_vm2, %v4523_v39 }
 0x390   :  { %3085 = vmatprep.mubr.msk.f32.mxu0 %vm3800_vm1, %v3799_v2 }
 0x393   :  { %3086 = vmatmul.mubr.msk.f32.gmra.mxu0 %vm358_vm2, %v4532_v42 }
 0x394   :  { %3088 = vmatprep.mubr.msk.f32.mxu0 %vm3800_vm1, %v3799_v2 }
 0x397   :  { %3089 = vmatmul.mubr.msk.f32.gmra.mxu0 %vm358_vm2, %v4541_v43 }
 0x398   :  { %3091 = vmatprep.mubr.msk.f32.mxu0 %vm3800_vm1, %v3799_v2 }
 0x39b   :  { %3092 = vmatmul.mubr.msk.f32.gmra.mxu0 %vm358_vm2, %v4550_v44 }
 0x39c   :  { %3094 = vmatprep.mubr.msk.f32.mxu0 %vm3800_vm1, %v3799_v2 }
 0x39f   :  { %3095 = vmatmul.mubr.msk.f32.gmra.mxu0 %vm358_vm2, %v4559_v45 }
 0x3a0   :  { %3097 = vmatprep.mubr.msk.f32.mxu0 %vm3800_vm1, %v3799_v2 }
 0x3a3   :  { %3098 = vmatmul.mubr.msk.f32.gmra.mxu0 %vm358_vm2, %v4568_v46 }
 0x3a4   :  { %3100 = vmatprep.mubr.msk.f32.mxu0 %vm3800_vm1, %v3799_v2 }
 0x3a7   :  { %3101 = vmatmul.mubr.msk.f32.gmra.mxu0 %vm358_vm2, %v4577_v47 }
 0x3a8   :  { %3103 = vmatprep.mubr.msk.f32.mxu0 %vm3800_vm1, %v3799_v2 }
 0x3ab   :  { %3104 = vmatmul.mubr.msk.f32.gmra.mxu0 %vm358_vm2, %v4586_v48 }
 0x3ac   :  { %3171 = vmatprep.mubr.msk.f32.mxu0 %vm3800_vm1, %v3799_v2 }
 0x433   :  { %v1205_v49 = vpop.f32.mrf.mxu0 }
 0x434   :  { %v1279_v9 = vadd.f32 %v1205_v49, %v4151_v28 }
 0x435   :  { %v3063_v50 = vpop.f32.mrf.mxu0 }
 0x436   :  { %v2558_v10 = vmul.f32 -1.442695, %v1279_v9 }
 0x437   :  { %v1210_v51 = vpop.f32.mrf.mxu0 }
 0x438   :  { %v1280_v14 = vadd.f32 %v1210_v51, %v4155_v32  ;;  %3497 = vpow2.f32 %v2558_v10 }
 0x439   :  { %v3066_v52 = vpop.f32.mrf.mxu0 }
 0x43a   :  { %v2559_v25 = vmul.f32 -1.442695, %v1280_v14 }
 0x43b   :  { %v1215_v19 = vpop.f32.mrf.mxu0 }
 0x43c   :  { %v1281_v56 = vadd.f32 %v1215_v19, %v4153_v31 }
 0x43d   :  { %v3069_v16 = vpop.f32.mrf.mxu0 }
 0x43e   :  { %v2560_v63 = vmul.f32 -1.442695, %v1281_v56 }
 0x43f   :  { %v1220_v21 = vpop.f32.mrf.mxu0 }
 0x440   :  { %v1282_v11 = vadd.f32 %v1220_v21, %v4157_v37  ;;  %3499 = vpow2.f32 %v2560_v63 }
 0x441   :  { %v3072_v20 = vpop.f32.mrf.mxu0  ;;  %3501 = vpow2.f32 %v2559_v25 }
 0x442   :  { %v2561_v30 = vmul.f32 -1.442695, %v1282_v11 }
 0x443   :  { %v1225_v27 = vpop.f32.mrf.mxu0 }
 0x444   :  { %v1283_v18 = vadd.f32 %v1225_v27, %v4162_v55  ;;  %3503 = vpow2.f32 %v2561_v30 }
 0x445   :  { %v3075_v22 = vpop.f32.mrf.mxu0  ;;  %v3498_v52 = vpop.eup %3497 }
 0x446   :  { %v2562_v54 = vmul.f32 -1.442695, %v1283_v18  ;;  %v1299_v14 = vadd.f32 1.0, %v3498_v52 }
 0x447   :  { %v1230_v57 = vpop.f32.mrf.mxu0 }
 0x448   :  { %3505 = vpow2.f32 %v2562_v54 }
 0x449   :  { %v3078_v3 = vpop.f32.mrf.mxu0  ;;  %3507 = vrcp.f32 %v1299_v14 }
 0x44b   :  { %v1235_v35 = vpop.f32.mrf.mxu0 }
 0x44d   :  { %v3081_v49 = vpop.f32.mrf.mxu0  ;;  %v3500_v19 = vpop.eup %3499 }
 0x44e   :  { %v3502_v16 = vpop.eup %3501  ;;  %v1301_v11 = vadd.f32 1.0, %v3500_v19 }
 0x44f   :  { %v1240_v50 = vpop.f32.mrf.mxu0  ;;  %v1300_v20 = vadd.f32 1.0, %v3502_v16 }
 0x450   :  { %3509 = vrcp.f32 %v1301_v11  ;;  %v1316_v22 = vadd.f32 %v1240_v50, %v4184_v12 }
 0x451   :  { %v3084_v51 = vpop.f32.mrf.mxu0  ;;  %v3504_v56 = vpop.eup %3503  ;;  %3511 = vrcp.f32 %v1300_v20 }
 0x452   :  { %v1302_v27 = vadd.f32 1.0, %v3504_v56  ;;  %v1315_v51 = vadd.f32 %v1235_v35, %v4191_v15  ;;  %v2565_v16 = vmul.f32 -1.442695, %v1316_v22 }
 0x453   :  { %v1245_v9 = vpop.f32.mrf.mxu0 }
 0x454   :  { %v1317_v10 = vadd.f32 %v1245_v9, %v4175_v40  ;;  %3513 = vrcp.f32 %v1302_v27  ;;  %v1314_v9 = vadd.f32 %v1230_v57, %v4188_v58  ;;  %v2564_v14 = vmul.f32 -1.442695, %v1315_v51 }
 0x455   :  { %v3087_v21 = vpop.f32.mrf.mxu0  ;;  %v3506_v25 = vpop.eup %3505 }
 0x456   :  { %v2566_v54 = vmul.f32 -1.442695, %v1317_v10  ;;  %v1303_v3 = vadd.f32 1.0, %v3506_v25  ;;  %v2563_v11 = vmul.f32 -1.442695, %v1314_v9  ;;  %v3508_v25 = vpop.eup %3507 }
 0x457   :  { %v1250_v63 = vpop.f32.mrf.mxu0 }
 0x458   :  { %v1318_v30 = vadd.f32 %v1250_v63, %v4178_v61  ;;  %3515 = vpow2.f32 %v2566_v54 }
 0x459   :  { %v3090_v18 = vpop.f32.mrf.mxu0  ;;  %3517 = vrcp.f32 %v1303_v3 }
 0x45a   :  { %v2567_v52 = vmul.f32 -1.442695, %v1318_v30 }
 0x45b   :  { %v1255_v49 = vpop.f32.mrf.mxu0 }
 0x45c   :  { %3519 = vpow2.f32 %v2567_v52  ;;  %v1349_v50 = vadd.f32 %v1255_v49, %v4198_v41 }
 0x45d   :  { %v3093_v19 = vpop.f32.mrf.mxu0  ;;  %3521 = vpow2.f32 %v2565_v16  ;;  %v3510_v57 = vpop.eup %3509 }
 0x45e   :  { %3523 = vpow2.f32 %v2564_v14  ;;  %v1354_v27 = vmul.f32 %v3508_v25, %v1349_v50  ;;  %v3512_v18 = vpop.eup %3511 }
 0x45f   :  { %v1260_v56 = vpop.f32.mrf.mxu0  ;;  %3525 = vpow2.f32 %v2563_v11 }
 0x460   :  { %v1350_v35 = vadd.f32 %v1260_v56, %v4194_v23  ;;  %v1359_v9 = vadd.f32 %v1354_v27, %v4205_v26 }
 0x461   :  { %v3096_v21 = vpop.f32.mrf.mxu0  ;;  %v3514_v3 = vpop.eup %3513 }
 0x462   :  { %v1355_v51 = vmul.f32 %v3512_v18, %v1350_v35 }
 0x463   :  { %v1265_v10 = vpop.f32.mrf.mxu0 }
 0x464   :  { %v1351_v20 = vadd.f32 %v1265_v10, %v4180_v59  ;;  %v1360_v10 = vadd.f32 %v1355_v51, %v4215_v34 }
 0x465   :  { %v3099_v63 = vpop.f32.mrf.mxu0  ;;  %v3516_v19 = vpop.eup %3515 }
 0x466   :  { %v1356_v22 = vmul.f32 %v3510_v57, %v1351_v20  ;;  %v3518_v14 = vpop.eup %3517  ;;  %v1337_v25 = vadd.f32 1.0, %v3516_v19 }
 0x467   :  { %v1270_v30 = vpop.f32.mrf.mxu0 }
 0x468   :  { %v1352_v54 = vadd.f32 %v1270_v30, %v4170_v24  ;;  %v1361_v56 = vadd.f32 %v1356_v22, %v4208_v13 }
 0x469   :  { %v3102_v52 = vpop.f32.mrf.mxu0  ;;  %v3520_v50 = vpop.eup %3519 }
 0x46a   :  { %v1357_v49 = vmul.f32 %v3514_v3, %v1352_v54  ;;  %v3522_v35 = vpop.eup %3521  ;;  %v1338_v57 = vadd.f32 1.0, %v3520_v50 }
 0x46b   :  { %v1275_v16 = vpop.f32.mrf.mxu0  ;;  %v3524_v30 = vpop.eup %3523  ;;  %v1336_v18 = vadd.f32 1.0, %v3522_v35 }
 0x46c   :  { %v1362_v21 = vadd.f32 %v1357_v49, %v4212_v8  ;;  %v1353_v11 = vadd.f32 %v1275_v16, %v4166_v17  ;;  %v3526_v22 = vpop.eup %3525  ;;  %v1335_v54 = vadd.f32 1.0, %v3524_v30 }
 0x46d   :  { %v3105_v20 = vpop.f32.mrf.mxu0  ;;  %v1334_v3 = vadd.f32 1.0, %v3526_v22 }
 0x46e   :  { %3527 = vtanh.f32 %v1362_v21  ;;  %v1358_v63 = vmul.f32 %v3518_v14, %v1353_v11 }
 0x46f   :  { %3529 = vtanh.f32 %v1359_v9 }
 0x470   :  { %3531 = vtanh.f32 %v1361_v56  ;;  %v1363_v27 = vadd.f32 %v1358_v63, %v4224_v38 }
 0x471   :  { %3533 = vtanh.f32 %v1360_v10 }
 0x472   :  { %3535 = vtanh.f32 %v1363_v27 }
 0x473   :  { %3537 = vrcp.f32 %v1337_v25 }
 0x474   :  { %3539 = vrcp.f32 %v1338_v57 }
 0x475   :  { %3541 = vrcp.f32 %v1336_v18 }
 0x476   :  { %3543 = vrcp.f32 %v1335_v54 }
 0x477   :  { %3545 = vrcp.f32 %v1334_v3 }
 0x47b   :  { %v3528_v51 = vpop.eup %3527 }
 0x47c   :  { %v3530_v52 = vpop.eup %3529  ;;  %v1372_v9 = vsub.f32 %v4440_v0, %v3528_v51 }
 0x47d   :  { %v3532_v49 = vpop.eup %3531  ;;  %v1369_v57 = vsub.f32 %v4452_v7, %v3530_v52 }
 0x47e   :  { %v3534_v19 = vpop.eup %3533  ;;  %v1371_v21 = vsub.f32 %v4444_v1, %v3532_v49 }
 0x47f   :  { %v3536_v16 = vpop.eup %3535  ;;  %v1370_v20 = vsub.f32 %v4448_v6, %v3534_v19 }
 0x480   :  { %v3538_v14 = vpop.eup %3537  ;;  %v1373_v56 = vsub.f32 %v4436_v53, %v3536_v16 }
 0x481   :  { %v3540_v11 = vpop.eup %3539  ;;  %v1377_v10 = vmul.f32 %v3538_v14, %v1372_v9 }
 0x482   :  { %v1378_v50 = vmul.f32 %v3540_v11, %v1373_v56  ;;  %v3542_v63 = vpop.eup %3541 }
 0x483   :  { %v1376_v25 = vmul.f32 %v3542_v63, %v1371_v21  ;;  %v3544_v27 = vpop.eup %3543  ;;  %v4620_v0 = vadd.f32 %v3528_v51, %v1377_v10 }
 0x484   :  { %v4616_v35 = vadd.f32 %v3536_v16, %v1378_v50  ;;  %v1375_v30 = vmul.f32 %v3544_v27, %v1370_v20  ;;  %v3546_v53 = vpop.eup %3545 }
 0x485   :  { %v4624_v1 = vadd.f32 %v3532_v49, %v1376_v25  ;;  %v1374_v6 = vmul.f32 %v3546_v53, %v1369_v57 }
 0x486   :  { %3107 = vmatpush3.msra.mxu1 %v4616_v35  ;;  %v4628_v18 = vadd.f32 %v3534_v19, %v1375_v30 }
 0x487   :  { %3108 = vmatprep.subr.mxu1 %v3799_v2  ;;  %v4632_v7 = vadd.f32 %v3530_v52, %v1374_v6 }
 0x488   :  { %3109 = vmatpush3.msra.mxu1 %v4620_v0 }
 0x489   :  { %3110 = vmatprep.subr.mxu1 %v3799_v2 }
 0x48a   :  { %3111 = vmatpush3.msra.mxu1 %v4624_v1 }
 0x48b   :  { %3112 = vmatprep.subr.mxu1 %v3799_v2 }
 0x48c   :  { %3113 = vmatpush3.msra.mxu1 %v4628_v18 }
 0x48d   :  { %3114 = vmatprep.subr.mxu1 %v3799_v2 }
 0x48e   :  { %3115 = vmatpush3.msra.mxu1 %v4632_v7 }
 0x48f   :  { %3117 = vmatmul.mubr.msk.f32.vlgmr.msra.gmra.mxu1 %vm358_vm2, %v4459_v60  ;;  %3216 = vmatprep.subr.mxu1 %v3799_v2 }
 0x490   :  { %3119 = vmatprep.mubr.msk.f32.mxu1 %vm3800_vm1, %v3799_v2 }
 0x493   :  { %3120 = vmatmul.mubr.msk.f32.gmra.mxu1 %vm358_vm2, %v4469_v62 }
 0x494   :  { %3122 = vmatprep.mubr.msk.f32.mxu1 %vm3800_vm1, %v3799_v2 }
 0x497   :  { %3123 = vmatmul.mubr.msk.f32.gmra.mxu1 %vm358_vm2, %v4478_v5 }
 0x498   :  { %3125 = vmatprep.mubr.msk.f32.mxu1 %vm3800_vm1, %v3799_v2 }
 0x49b   :  { %3126 = vmatmul.mubr.msk.f32.gmra.mxu1 %vm358_vm2, %v4487_v4 }
 0x49c   :  { %3128 = vmatprep.mubr.msk.f32.mxu1 %vm3800_vm1, %v3799_v2 }
 0x49f   :  { %3129 = vmatmul.mubr.msk.f32.gmra.mxu1 %vm358_vm2, %v4496_v29 }
 0x4a0   :  { %3131 = vmatprep.mubr.msk.f32.mxu1 %vm3800_vm1, %v3799_v2 }
 0x4a3   :  { %3132 = vmatmul.mubr.msk.f32.gmra.mxu1 %vm358_vm2, %v4505_v33 }
 0x4a4   :  { %3134 = vmatprep.mubr.msk.f32.mxu1 %vm3800_vm1, %v3799_v2 }
 0x4a7   :  { %3135 = vmatmul.mubr.msk.f32.gmra.mxu1 %vm358_vm2, %v4514_v36 }
 0x4a8   :  { %3137 = vmatprep.mubr.msk.f32.mxu1 %vm3800_vm1, %v3799_v2 }
 0x4ab   :  { %3138 = vmatmul.mubr.msk.f32.gmra.mxu1 %vm358_vm2, %v4523_v39 }
 0x4ac   :  { %3140 = vmatprep.mubr.msk.f32.mxu1 %vm3800_vm1, %v3799_v2 }
 0x4af   :  { %3141 = vmatmul.mubr.msk.f32.gmra.mxu1 %vm358_vm2, %v4532_v42 }
 0x4b0   :  { %3143 = vmatprep.mubr.msk.f32.mxu1 %vm3800_vm1, %v3799_v2 }
 0x4b3   :  { %3144 = vmatmul.mubr.msk.f32.gmra.mxu1 %vm358_vm2, %v4541_v43 }
 0x4b4   :  { %3146 = vmatprep.mubr.msk.f32.mxu1 %vm3800_vm1, %v3799_v2 }
 0x4b7   :  { %3147 = vmatmul.mubr.msk.f32.gmra.mxu1 %vm358_vm2, %v4550_v44 }
 0x4b8   :  { %3149 = vmatprep.mubr.msk.f32.mxu1 %vm3800_vm1, %v3799_v2 }
 0x4bb   :  { %3150 = vmatmul.mubr.msk.f32.gmra.mxu1 %vm358_vm2, %v4559_v45 }
 0x4bc   :  { %3152 = vmatprep.mubr.msk.f32.mxu1 %vm3800_vm1, %v3799_v2 }
 0x4bf   :  { %3153 = vmatmul.mubr.msk.f32.gmra.mxu1 %vm358_vm2, %v4568_v46 }
 0x4c0   :  { %3155 = vmatprep.mubr.msk.f32.mxu1 %vm3800_vm1, %v3799_v2 }
 0x4c3   :  { %3156 = vmatmul.mubr.msk.f32.gmra.mxu1 %vm358_vm2, %v4577_v47 }
 0x4c4   :  { %3158 = vmatprep.mubr.msk.f32.mxu1 %vm3800_vm1, %v3799_v2 }
 0x4c7   :  { %3159 = vmatmul.mubr.msk.f32.gmra.mxu1 %vm358_vm2, %v4586_v48 }
 0x4c8   :  { %3226 = vmatprep.mubr.msk.f32.mxu1 %vm3800_vm1, %v3799_v2 }
 0x54f   :  { %v1450_v22 = vpop.f32.mrf.mxu1 }
 0x550   :  { %v1524_v49 = vadd.f32 %v1450_v22, %v4151_v28 }
 0x551   :  { %v3118_v54 = vpop.f32.mrf.mxu1 }
 0x552   :  { %v2583_v21 = vmul.f32 -1.442695, %v1524_v49 }
 0x553   :  { %v1455_v3 = vpop.f32.mrf.mxu1 }
 0x554   :  { %v1525_v16 = vadd.f32 %v1455_v3, %v4155_v32  ;;  %3547 = vpow2.f32 %v2583_v21 }
 0x555   :  { %v3121_v51 = vpop.f32.mrf.mxu1 }
 0x556   :  { %v2584_v10 = vmul.f32 -1.442695, %v1525_v16 }
 0x557   :  { %v1460_v52 = vpop.f32.mrf.mxu1 }
 0x558   :  { %v1526_v9 = vadd.f32 %v1460_v52, %v4153_v31 }
 0x559   :  { %v3124_v19 = vpop.f32.mrf.mxu1 }
 0x55a   :  { %v2585_v50 = vmul.f32 -1.442695, %v1526_v9 }
 0x55b   :  { %v1465_v14 = vpop.f32.mrf.mxu1 }
 0x55c   :  { %v1527_v56 = vadd.f32 %v1465_v14, %v4157_v37  ;;  %3549 = vpow2.f32 %v2585_v50 }
 0x55d   :  { %v3127_v11 = vpop.f32.mrf.mxu1  ;;  %3551 = vpow2.f32 %v2584_v10 }
 0x55e   :  { %v2586_v63 = vmul.f32 -1.442695, %v1527_v56 }
 0x55f   :  { %v1470_v20 = vpop.f32.mrf.mxu1 }
 0x560   :  { %v1528_v25 = vadd.f32 %v1470_v20, %v4162_v55  ;;  %3553 = vpow2.f32 %v2586_v63 }
 0x561   :  { %v3130_v57 = vpop.f32.mrf.mxu1  ;;  %v3548_v51 = vpop.eup %3547 }
 0x562   :  { %v2587_v27 = vmul.f32 -1.442695, %v1528_v25  ;;  %v1544_v16 = vadd.f32 1.0, %v3548_v51 }
 0x563   :  { %v1475_v30 = vpop.f32.mrf.mxu1 }
 0x564   :  { %3555 = vpow2.f32 %v2587_v27 }
 0x565   :  { %v3133_v53 = vpop.f32.mrf.mxu1  ;;  %3557 = vrcp.f32 %v1544_v16 }
 0x567   :  { %v1480_v6 = vpop.f32.mrf.mxu1 }
 0x569   :  { %v3136_v22 = vpop.f32.mrf.mxu1  ;;  %v3550_v52 = vpop.eup %3549 }
 0x56a   :  { %v3552_v19 = vpop.eup %3551  ;;  %v1546_v56 = vadd.f32 1.0, %v3550_v52 }
 0x56b   :  { %v1485_v54 = vpop.f32.mrf.mxu1  ;;  %v1545_v11 = vadd.f32 1.0, %v3552_v19 }
 0x56c   :  { %3559 = vrcp.f32 %v1546_v56  ;;  %v1561_v57 = vadd.f32 %v1485_v54, %v4184_v12 }
 0x56d   :  { %v3139_v3 = vpop.f32.mrf.mxu1  ;;  %v3554_v9 = vpop.eup %3553  ;;  %3561 = vrcp.f32 %v1545_v11 }
 0x56e   :  { %v1547_v20 = vadd.f32 1.0, %v3554_v9  ;;  %v1560_v3 = vadd.f32 %v1480_v6, %v4191_v15  ;;  %v2590_v19 = vmul.f32 -1.442695, %v1561_v57 }
 0x56f   :  { %v1490_v49 = vpop.f32.mrf.mxu1 }
 0x570   :  { %v1562_v21 = vadd.f32 %v1490_v49, %v4175_v40  ;;  %3563 = vrcp.f32 %v1547_v20  ;;  %v1559_v49 = vadd.f32 %v1475_v30, %v4188_v58  ;;  %v2589_v16 = vmul.f32 -1.442695, %v1560_v3 }
 0x571   :  { %v3142_v14 = vpop.f32.mrf.mxu1  ;;  %v3556_v10 = vpop.eup %3555 }
 0x572   :  { %v2591_v27 = vmul.f32 -1.442695, %v1562_v21  ;;  %v1548_v53 = vadd.f32 1.0, %v3556_v10  ;;  %v2588_v56 = vmul.f32 -1.442695, %v1559_v49  ;;  %v3558_v10 = vpop.eup %3557 }
 0x573   :  { %v1495_v50 = vpop.f32.mrf.mxu1 }
 0x574   :  { %v1563_v63 = vadd.f32 %v1495_v50, %v4178_v61  ;;  %3565 = vpow2.f32 %v2591_v27 }
 0x575   :  { %v3145_v25 = vpop.f32.mrf.mxu1  ;;  %3567 = vrcp.f32 %v1548_v53 }
 0x576   :  { %v2592_v51 = vmul.f32 -1.442695, %v1563_v63 }
 0x577   :  { %v1500_v22 = vpop.f32.mrf.mxu1 }
 0x578   :  { %3569 = vpow2.f32 %v2592_v51  ;;  %v1594_v54 = vadd.f32 %v1500_v22, %v4198_v41 }
 0x579   :  { %v3148_v52 = vpop.f32.mrf.mxu1  ;;  %3571 = vpow2.f32 %v2590_v19  ;;  %v3560_v30 = vpop.eup %3559 }
 0x57a   :  { %3573 = vpow2.f32 %v2589_v16  ;;  %v1599_v20 = vmul.f32 %v3558_v10, %v1594_v54  ;;  %v3562_v25 = vpop.eup %3561 }
 0x57b   :  { %v1505_v9 = vpop.f32.mrf.mxu1  ;;  %3575 = vpow2.f32 %v2588_v56 }
 0x57c   :  { %v1595_v6 = vadd.f32 %v1505_v9, %v4194_v23  ;;  %v1604_v49 = vadd.f32 %v1599_v20, %v4205_v26 }
 0x57d   :  { %v3151_v14 = vpop.f32.mrf.mxu1  ;;  %v3564_v53 = vpop.eup %3563 }
 0x57e   :  { %v1600_v3 = vmul.f32 %v3562_v25, %v1595_v6 }
 0x57f   :  { %v1510_v21 = vpop.f32.mrf.mxu1 }
 0x580   :  { %v1596_v11 = vadd.f32 %v1510_v21, %v4180_v59  ;;  %v1605_v21 = vadd.f32 %v1600_v3, %v4215_v34 }
 0x581   :  { %v3154_v50 = vpop.f32.mrf.mxu1  ;;  %v3566_v52 = vpop.eup %3565 }
 0x582   :  { %v1601_v57 = vmul.f32 %v3560_v30, %v1596_v11  ;;  %v3568_v16 = vpop.eup %3567  ;;  %v1582_v10 = vadd.f32 1.0, %v3566_v52 }
 0x583   :  { %v1515_v63 = vpop.f32.mrf.mxu1 }
 0x584   :  { %v1597_v27 = vadd.f32 %v1515_v63, %v4170_v24  ;;  %v1606_v9 = vadd.f32 %v1601_v57, %v4208_v13 }
 0x585   :  { %v3157_v51 = vpop.f32.mrf.mxu1  ;;  %v3570_v54 = vpop.eup %3569 }
 0x586   :  { %v1602_v22 = vmul.f32 %v3564_v53, %v1597_v27  ;;  %v3572_v6 = vpop.eup %3571  ;;  %v1583_v30 = vadd.f32 1.0, %v3570_v54 }
 0x587   :  { %v1520_v19 = vpop.f32.mrf.mxu1  ;;  %v3574_v63 = vpop.eup %3573  ;;  %v1581_v25 = vadd.f32 1.0, %v3572_v6 }
 0x588   :  { %v1607_v14 = vadd.f32 %v1602_v22, %v4212_v8  ;;  %v1598_v56 = vadd.f32 %v1520_v19, %v4166_v17  ;;  %v3576_v57 = vpop.eup %3575  ;;  %v1580_v27 = vadd.f32 1.0, %v3574_v63 }
 0x589   :  { %v3160_v11 = vpop.f32.mrf.mxu1  ;;  %v1579_v53 = vadd.f32 1.0, %v3576_v57 }
 0x58a   :  { %3577 = vtanh.f32 %v1607_v14  ;;  %v1603_v50 = vmul.f32 %v3568_v16, %v1598_v56 }
 0x58b   :  { %3579 = vtanh.f32 %v1604_v49 }
 0x58c   :  { %3581 = vtanh.f32 %v1606_v9  ;;  %v1608_v20 = vadd.f32 %v1603_v50, %v4224_v38 }
 0x58d   :  { %3583 = vtanh.f32 %v1605_v21 }
 0x58e   :  { %3585 = vtanh.f32 %v1608_v20 }
 0x58f   :  { %3587 = vrcp.f32 %v1582_v10 }
 0x590   :  { %3589 = vrcp.f32 %v1583_v30 }
 0x591   :  { %3591 = vrcp.f32 %v1581_v25 }
 0x592   :  { %3593 = vrcp.f32 %v1580_v27 }
 0x593   :  { %3595 = vrcp.f32 %v1579_v53 }
 0x597   :  { %v3578_v3 = vpop.eup %3577 }
 0x598   :  { %v3580_v51 = vpop.eup %3579  ;;  %v1617_v49 = vsub.f32 %v4620_v0, %v3578_v3 }
 0x599   :  { %v3582_v22 = vpop.eup %3581  ;;  %v1614_v30 = vsub.f32 %v4632_v7, %v3580_v51 }
 0x59a   :  { %v3584_v52 = vpop.eup %3583  ;;  %v1616_v14 = vsub.f32 %v4624_v1, %v3582_v22 }
 0x59b   :  { %v3586_v19 = vpop.eup %3585  ;;  %v1615_v11 = vsub.f32 %v4628_v18, %v3584_v52 }
 0x59c   :  { %v3588_v16 = vpop.eup %3587  ;;  %v1618_v9 = vsub.f32 %v4616_v35, %v3586_v19 }
 0x59d   :  { %v3590_v56 = vpop.eup %3589  ;;  %v1622_v21 = vmul.f32 %v3588_v16, %v1617_v49 }
 0x59e   :  { %v1623_v54 = vmul.f32 %v3590_v56, %v1618_v9  ;;  %v3592_v50 = vpop.eup %3591 }
 0x59f   :  { %v1621_v10 = vmul.f32 %v3592_v50, %v1616_v14  ;;  %v3594_v20 = vpop.eup %3593  ;;  %v4725_v0 = vadd.f32 %v3578_v3, %v1622_v21 }
 0x5a0   :  { %v4721_v6 = vadd.f32 %v3586_v19, %v1623_v54  ;;  %v1620_v63 = vmul.f32 %v3594_v20, %v1615_v11  ;;  %v3596_v35 = vpop.eup %3595 }
 0x5a1   :  { %v4729_v1 = vadd.f32 %v3582_v22, %v1621_v10  ;;  %v1619_v18 = vmul.f32 %v3596_v35, %v1614_v30 }
 0x5a2   :  { %3162 = vmatpush3.msra.mxu0 %v4721_v6  ;;  %v4733_v25 = vadd.f32 %v3584_v52, %v1620_v63 }
 0x5a3   :  { %3163 = vmatprep.subr.mxu0 %v3799_v2  ;;  %v4737_v7 = vadd.f32 %v3580_v51, %v1619_v18 }
 0x5a4   :  { %3164 = vmatpush3.msra.mxu0 %v4725_v0 }
 0x5a5   :  { %3165 = vmatprep.subr.mxu0 %v3799_v2 }
 0x5a6   :  { %3166 = vmatpush3.msra.mxu0 %v4729_v1 }
 0x5a7   :  { %3167 = vmatprep.subr.mxu0 %v3799_v2 }
 0x5a8   :  { %3168 = vmatpush3.msra.mxu0 %v4733_v25 }
 0x5a9   :  { %3169 = vmatprep.subr.mxu0 %v3799_v2 }
 0x5aa   :  { %3170 = vmatpush3.msra.mxu0 %v4737_v7 }
 0x5ab   :  { %3172 = vmatmul.mubr.msk.f32.vlgmr.msra.gmra.mxu0 %vm358_vm2, %v4459_v60  ;;  %3271 = vmatprep.subr.mxu0 %v3799_v2 }
 0x5ac   :  { %3174 = vmatprep.mubr.msk.f32.mxu0 %vm3800_vm1, %v3799_v2 }
 0x5af   :  { %3175 = vmatmul.mubr.msk.f32.gmra.mxu0 %vm358_vm2, %v4469_v62 }
 0x5b0   :  { %3177 = vmatprep.mubr.msk.f32.mxu0 %vm3800_vm1, %v3799_v2 }
 0x5b3   :  { %3178 = vmatmul.mubr.msk.f32.gmra.mxu0 %vm358_vm2, %v4478_v5 }
 0x5b4   :  { %3180 = vmatprep.mubr.msk.f32.mxu0 %vm3800_vm1, %v3799_v2 }
 0x5b7   :  { %3181 = vmatmul.mubr.msk.f32.gmra.mxu0 %vm358_vm2, %v4487_v4 }
 0x5b8   :  { %3183 = vmatprep.mubr.msk.f32.mxu0 %vm3800_vm1, %v3799_v2 }
 0x5bb   :  { %3184 = vmatmul.mubr.msk.f32.gmra.mxu0 %vm358_vm2, %v4496_v29 }
 0x5bc   :  { %3186 = vmatprep.mubr.msk.f32.mxu0 %vm3800_vm1, %v3799_v2 }
 0x5bf   :  { %3187 = vmatmul.mubr.msk.f32.gmra.mxu0 %vm358_vm2, %v4505_v33 }
 0x5c0   :  { %3189 = vmatprep.mubr.msk.f32.mxu0 %vm3800_vm1, %v3799_v2 }
 0x5c3   :  { %3190 = vmatmul.mubr.msk.f32.gmra.mxu0 %vm358_vm2, %v4514_v36 }
 0x5c4   :  { %3192 = vmatprep.mubr.msk.f32.mxu0 %vm3800_vm1, %v3799_v2 }
 0x5c7   :  { %3193 = vmatmul.mubr.msk.f32.gmra.mxu0 %vm358_vm2, %v4523_v39 }
 0x5c8   :  { %3195 = vmatprep.mubr.msk.f32.mxu0 %vm3800_vm1, %v3799_v2 }
 0x5cb   :  { %3196 = vmatmul.mubr.msk.f32.gmra.mxu0 %vm358_vm2, %v4532_v42 }
 0x5cc   :  { %3198 = vmatprep.mubr.msk.f32.mxu0 %vm3800_vm1, %v3799_v2 }
 0x5cf   :  { %3199 = vmatmul.mubr.msk.f32.gmra.mxu0 %vm358_vm2, %v4541_v43 }
 0x5d0   :  { %3201 = vmatprep.mubr.msk.f32.mxu0 %vm3800_vm1, %v3799_v2 }
 0x5d3   :  { %3202 = vmatmul.mubr.msk.f32.gmra.mxu0 %vm358_vm2, %v4550_v44 }
 0x5d4   :  { %3204 = vmatprep.mubr.msk.f32.mxu0 %vm3800_vm1, %v3799_v2 }
 0x5d7   :  { %3205 = vmatmul.mubr.msk.f32.gmra.mxu0 %vm358_vm2, %v4559_v45 }
 0x5d8   :  { %3207 = vmatprep.mubr.msk.f32.mxu0 %vm3800_vm1, %v3799_v2 }
 0x5db   :  { %3208 = vmatmul.mubr.msk.f32.gmra.mxu0 %vm358_vm2, %v4568_v46 }
 0x5dc   :  { %3210 = vmatprep.mubr.msk.f32.mxu0 %vm3800_vm1, %v3799_v2 }
 0x5df   :  { %3211 = vmatmul.mubr.msk.f32.gmra.mxu0 %vm358_vm2, %v4577_v47 }
 0x5e0   :  { %3213 = vmatprep.mubr.msk.f32.mxu0 %vm3800_vm1, %v3799_v2 }
 0x5e3   :  { %3214 = vmatmul.mubr.msk.f32.gmra.mxu0 %vm358_vm2, %v4586_v48 }
 0x5e4   :  { %3281 = vmatprep.mubr.msk.f32.mxu0 %vm3800_vm1, %v3799_v2 }
 0x66b   :  { %v1695_v60 = vpop.f32.mrf.mxu0 }
 0x66c   :  { %v1769_v33 = vadd.f32 %v1695_v60, %v4151_v28 }
 0x66d   :  { %v3173_v62 = vpop.f32.mrf.mxu0 }
 0x66e   :  { %v2608_v45 = vmul.f32 -1.442695, %v1769_v33 }
 0x66f   :  { %v1700_v5 = vpop.f32.mrf.mxu0 }
 0x670   :  { %v1770_v42 = vadd.f32 %v1700_v5, %v4155_v32  ;;  %3597 = vpow2.f32 %v2608_v45 }
 0x671   :  { %v3176_v4 = vpop.f32.mrf.mxu0 }
 0x672   :  { %v2609_v48 = vmul.f32 -1.442695, %v1770_v42 }
 0x673   :  { %v1705_v29 = vpop.f32.mrf.mxu0 }
 0x674   :  { %v1771_v39 = vadd.f32 %v1705_v29, %v4153_v31 }
 0x675   :  { %v3179_v36 = vpop.f32.mrf.mxu0 }
 0x676   :  { %v2610_v47 = vmul.f32 -1.442695, %v1771_v39 }
 0x677   :  { %v1710_v43 = vpop.f32.mrf.mxu0 }
 0x678   :  { %v1772_v44 = vadd.f32 %v1710_v43, %v4157_v37  ;;  %3599 = vpow2.f32 %v2610_v47 }
 0x679   :  { %v3182_v46 = vpop.f32.mrf.mxu0  ;;  %3601 = vpow2.f32 %v2609_v48 }
 0x67a   :  { %v2611_v27 = vmul.f32 -1.442695, %v1772_v44 }
 0x67b   :  { %v1715_v57 = vpop.f32.mrf.mxu0 }
 0x67c   :  { %v1773_v53 = vadd.f32 %v1715_v57, %v4162_v55  ;;  %3603 = vpow2.f32 %v2611_v27 }
 0x67d   :  { %v3185_v3 = vpop.f32.mrf.mxu0  ;;  %v3598_v14 = vpop.eup %3597 }
 0x67e   :  { %v2612_v51 = vmul.f32 -1.442695, %v1773_v53  ;;  %v1789_v50 = vadd.f32 1.0, %v3598_v14 }
 0x67f   :  { %v1720_v22 = vpop.f32.mrf.mxu0 }
 0x680   :  { %3605 = vpow2.f32 %v2612_v51  ;;  %v1804_v44 = vadd.f32 %v1720_v22, %v4188_v58 }
 0x681   :  { %v3188_v52 = vpop.f32.mrf.mxu0  ;;  %3607 = vrcp.f32 %v1789_v50 }
 0x682   :  { %v2613_v57 = vmul.f32 -1.442695, %v1804_v44 }
 0x683   :  { %v1725_v49 = vpop.f32.mrf.mxu0 }
 0x684   :  { %v1805_v39 = vadd.f32 %v1725_v49, %v4191_v15 }
 0x685   :  { %v3191_v19 = vpop.f32.mrf.mxu0  ;;  %v3600_v56 = vpop.eup %3599 }
 0x686   :  { %v3602_v21 = vpop.eup %3601  ;;  %v1791_v30 = vadd.f32 1.0, %v3600_v56  ;;  %v2614_v47 = vmul.f32 -1.442695, %v1805_v39 }
 0x687   :  { %v1730_v16 = vpop.f32.mrf.mxu0  ;;  %v1790_v63 = vadd.f32 1.0, %v3602_v21 }
 0x688   :  { %3609 = vrcp.f32 %v1791_v30  ;;  %v1806_v4 = vadd.f32 %v1730_v16, %v4184_v12 }
 0x689   :  { %v3194_v9 = vpop.f32.mrf.mxu0  ;;  %v3604_v11 = vpop.eup %3603  ;;  %3611 = vrcp.f32 %v1790_v63 }
 0x68a   :  { %v1792_v60 = vadd.f32 1.0, %v3604_v11  ;;  %v2615_v45 = vmul.f32 -1.442695, %v1806_v4 }
 0x68b   :  { %v1735_v54 = vpop.f32.mrf.mxu0 }
 0x68c   :  { %v1807_v20 = vadd.f32 %v1735_v54, %v4175_v40  ;;  %3613 = vrcp.f32 %v1792_v60 }
 0x68d   :  { %v3197_v10 = vpop.f32.mrf.mxu0  ;;  %v3606_v18 = vpop.eup %3605 }
 0x68e   :  { %v2616_v29 = vmul.f32 -1.442695, %v1807_v20  ;;  %v1793_v33 = vadd.f32 1.0, %v3606_v18  ;;  %v3608_v49 = vpop.eup %3607 }
 0x68f   :  { %v1740_v35 = vpop.f32.mrf.mxu0 }
 0x690   :  { %v1808_v62 = vadd.f32 %v1740_v35, %v4178_v61  ;;  %3615 = vpow2.f32 %v2616_v29 }
 0x691   :  { %v3200_v5 = vpop.f32.mrf.mxu0  ;;  %3617 = vrcp.f32 %v1793_v33 }
 0x692   :  { %v2617_v42 = vmul.f32 -1.442695, %v1808_v62 }
 0x693   :  { %v1745_v36 = vpop.f32.mrf.mxu0 }
 0x694   :  { %3619 = vpow2.f32 %v2617_v42  ;;  %v1839_v27 = vadd.f32 %v1745_v36, %v4198_v41 }
 0x695   :  { %v3203_v43 = vpop.f32.mrf.mxu0  ;;  %3621 = vpow2.f32 %v2615_v45  ;;  %v3610_v22 = vpop.eup %3609 }
 0x696   :  { %3623 = vpow2.f32 %v2614_v47  ;;  %v1844_v19 = vmul.f32 %v3608_v49, %v1839_v27  ;;  %v3612_v9 = vpop.eup %3611 }
 0x697   :  { %v1750_v46 = vpop.f32.mrf.mxu0  ;;  %3625 = vpow2.f32 %v2613_v57 }
 0x698   :  { %v1840_v51 = vadd.f32 %v1750_v46, %v4194_v23  ;;  %v1849_v30 = vadd.f32 %v1844_v19, %v4205_v26 }
 0x699   :  { %v3206_v48 = vpop.f32.mrf.mxu0  ;;  %v3614_v54 = vpop.eup %3613 }
 0x69a   :  { %v1845_v21 = vmul.f32 %v3612_v9, %v1840_v51 }
 0x69b   :  { %v1755_v53 = vpop.f32.mrf.mxu0 }
 0x69c   :  { %v1841_v3 = vadd.f32 %v1755_v53, %v4180_v59  ;;  %v1850_v5 = vadd.f32 %v1845_v21, %v4215_v34 }
 0x69d   :  { %v3209_v52 = vpop.f32.mrf.mxu0  ;;  %v3616_v10 = vpop.eup %3615 }
 0x69e   :  { %v1846_v14 = vmul.f32 %v3610_v22, %v1841_v3  ;;  %v3618_v63 = vpop.eup %3617  ;;  %v1827_v36 = vadd.f32 1.0, %v3616_v10 }
 0x69f   :  { %v1760_v16 = vpop.f32.mrf.mxu0 }
 0x6a0   :  { %v1842_v56 = vadd.f32 %v1760_v16, %v4170_v24  ;;  %v1851_v35 = vadd.f32 %v1846_v14, %v4208_v13 }
 0x6a1   :  { %v3212_v11 = vpop.f32.mrf.mxu0  ;;  %v3620_v62 = vpop.eup %3619 }
 0x6a2   :  { %v1847_v50 = vmul.f32 %v3614_v54, %v1842_v56  ;;  %v3622_v33 = vpop.eup %3621  ;;  %v1828_v39 = vadd.f32 1.0, %v3620_v62  ;;  %v4895_v62 = vld [vmem:[%s5122_s2 + $0x28] sm:$0xff] }
 0x6a3   :  { %v1765_v20 = vpop.f32.mrf.mxu0  ;;  %v3624_v43 = vpop.eup %3623  ;;  %v1826_v44 = vadd.f32 1.0, %v3622_v33  ;;  %v4931_v33 = vld [vmem:[%s5122_s2 + $0x48] sm:$0xff] }
 0x6a4   :  { %v1852_v18 = vadd.f32 %v1847_v50, %v4212_v8  ;;  %v1843_v60 = vadd.f32 %v1765_v20, %v4166_v17  ;;  %v3626_v45 = vpop.eup %3625  ;;  %v1825_v46 = vadd.f32 1.0, %v3624_v43  ;;  %v4849_v20 = vld [vmem:[%s5122_s2] sm:$0xff]  ;;  %v4967_v43 = vld [vmem:[%s5122_s2 + $0x68] sm:$0xff] }
 0x6a5   :  { %v3215_v4 = vpop.f32.mrf.mxu0  ;;  %v1824_v47 = vadd.f32 1.0, %v3626_v45 }
 0x6a6   :  { %3627 = vtanh.f32 %v1852_v18  ;;  %v1848_v29 = vmul.f32 %v3618_v63, %v1843_v60  ;;  %v4859_v63 = vld [vmem:[%s5122_s2 + $0x8] sm:$0xff]  ;;  %v4877_v18 = vld [vmem:[%s5122_s2 + $0x18] sm:$0xff]  ;;  %v4886_v60 = vld [vmem:[%s5122_s2 + $0x20] sm:$0xff] }
 0x6a7   :  { %3629 = vtanh.f32 %v1849_v30  ;;  %v4913_v4 = vld [vmem:[%s5122_s2 + $0x38] sm:$0xff] }
 0x6a8   :  { %3631 = vtanh.f32 %v1851_v35  ;;  %v1853_v42 = vadd.f32 %v1848_v29, %v4224_v38  ;;  %v4868_v35 = vld [vmem:[%s5122_s2 + $0x10] sm:$0xff]  ;;  %v4922_v29 = vld [vmem:[%s5122_s2 + $0x40] sm:$0xff] }
 0x6a9   :  { %3633 = vtanh.f32 %v1850_v5  ;;  %v4904_v5 = vld [vmem:[%s5122_s2 + $0x30] sm:$0xff] }
 0x6aa   :  { %3635 = vtanh.f32 %v1853_v42  ;;  %v4958_v42 = vld [vmem:[%s5122_s2 + $0x60] sm:$0xff] }
 0x6ab   :  { %3637 = vrcp.f32 %v1827_v36  ;;  %v4940_v36 = vld [vmem:[%s5122_s2 + $0x50] sm:$0xff] }
 0x6ac   :  { %3639 = vrcp.f32 %v1828_v39  ;;  %v4949_v39 = vld [vmem:[%s5122_s2 + $0x58] sm:$0xff] }
 0x6ad   :  { %3641 = vrcp.f32 %v1826_v44  ;;  %v4976_v44 = vld [vmem:[%s5122_s2 + $0x70] sm:$0xff] }
 0x6ae   :  { %3643 = vrcp.f32 %v1825_v46 }
 0x6af   :  { %3645 = vrcp.f32 %v1824_v47 }
 0x6b3   :  { %v3628_v48 = vpop.eup %3627 }
 0x6b4   :  { %v3630_v57 = vpop.eup %3629  ;;  %v1862_v3 = vsub.f32 %v4725_v0, %v3628_v48 }
 0x6b5   :  { %v3632_v27 = vpop.eup %3631  ;;  %v1859_v11 = vsub.f32 %v4737_v7, %v3630_v57 }
 0x6b6   :  { %v3634_v53 = vpop.eup %3633  ;;  %v1861_v22 = vsub.f32 %v4729_v1, %v3632_v27 }
 0x6b7   :  { %v3636_v51 = vpop.eup %3635  ;;  %v1860_v14 = vsub.f32 %v4733_v25, %v3634_v53 }
 0x6b8   :  { %v3638_v52 = vpop.eup %3637  ;;  %v1863_v49 = vsub.f32 %v4721_v6, %v3636_v51 }
 0x6b9   :  { %v3640_v19 = vpop.eup %3639  ;;  %v1867_v9 = vmul.f32 %v3638_v52, %v1862_v3 }
 0x6ba   :  { %v1868_v16 = vmul.f32 %v3640_v19, %v1863_v49  ;;  %v3642_v56 = vpop.eup %3641 }
 0x6bb   :  { %v1866_v21 = vmul.f32 %v3642_v56, %v1861_v22  ;;  %v3644_v50 = vpop.eup %3643  ;;  %v4830_v0 = vadd.f32 %v3628_v48, %v1867_v9 }
 0x6bc   :  { %v4826_v54 = vadd.f32 %v3636_v51, %v1868_v16  ;;  %v1865_v10 = vmul.f32 %v3644_v50, %v1860_v14  ;;  %v3646_v6 = vpop.eup %3645 }
 0x6bd   :  { %v4834_v1 = vadd.f32 %v3632_v27, %v1866_v21  ;;  %v1864_v25 = vmul.f32 %v3646_v6, %v1859_v11 }
 0x6be   :  { %3217 = vmatpush3.msra.mxu1 %v4826_v54  ;;  %v4838_v30 = vadd.f32 %v3634_v53, %v1865_v10 }
 0x6bf   :  { %3218 = vmatprep.subr.mxu1 %v3799_v2  ;;  %v4842_v7 = vadd.f32 %v3630_v57, %v1864_v25 }
 0x6c0   :  { %3219 = vmatpush3.msra.mxu1 %v4830_v0 }
 0x6c1   :  { %3220 = vmatprep.subr.mxu1 %v3799_v2 }
 0x6c2   :  { %3221 = vmatpush3.msra.mxu1 %v4834_v1 }
 0x6c3   :  { %3222 = vmatprep.subr.mxu1 %v3799_v2 }
 0x6c4   :  { %3223 = vmatpush3.msra.mxu1 %v4838_v30 }
 0x6c5   :  { %3224 = vmatprep.subr.mxu1 %v3799_v2 }
 0x6c6   :  { %3225 = vmatpush3.msra.mxu1 %v4842_v7 }
 0x6c7   :  { %3227 = vmatmul.mubr.msk.f32.vlgmr.msra.gmra.mxu1 %vm358_vm2, %v4849_v20  ;;  %3326 = vmatprep.subr.mxu1 %v3799_v2 }
 0x6c8   :  { %3229 = vmatprep.mubr.msk.f32.mxu1 %vm3800_vm1, %v3799_v2 }
 0x6cb   :  { %3230 = vmatmul.mubr.msk.f32.gmra.mxu1 %vm358_vm2, %v4859_v63 }
 0x6cc   :  { %3232 = vmatprep.mubr.msk.f32.mxu1 %vm3800_vm1, %v3799_v2 }
 0x6cf   :  { %3233 = vmatmul.mubr.msk.f32.gmra.mxu1 %vm358_vm2, %v4868_v35 }
 0x6d0   :  { %3235 = vmatprep.mubr.msk.f32.mxu1 %vm3800_vm1, %v3799_v2 }
 0x6d3   :  { %3236 = vmatmul.mubr.msk.f32.gmra.mxu1 %vm358_vm2, %v4877_v18 }
 0x6d4   :  { %3238 = vmatprep.mubr.msk.f32.mxu1 %vm3800_vm1, %v3799_v2 }
 0x6d7   :  { %3239 = vmatmul.mubr.msk.f32.gmra.mxu1 %vm358_vm2, %v4886_v60 }
 0x6d8   :  { %3241 = vmatprep.mubr.msk.f32.mxu1 %vm3800_vm1, %v3799_v2 }
 0x6db   :  { %3242 = vmatmul.mubr.msk.f32.gmra.mxu1 %vm358_vm2, %v4895_v62 }
 0x6dc   :  { %3244 = vmatprep.mubr.msk.f32.mxu1 %vm3800_vm1, %v3799_v2 }
 0x6df   :  { %3245 = vmatmul.mubr.msk.f32.gmra.mxu1 %vm358_vm2, %v4904_v5 }
 0x6e0   :  { %3247 = vmatprep.mubr.msk.f32.mxu1 %vm3800_vm1, %v3799_v2 }
 0x6e3   :  { %3248 = vmatmul.mubr.msk.f32.gmra.mxu1 %vm358_vm2, %v4913_v4 }
 0x6e4   :  { %3250 = vmatprep.mubr.msk.f32.mxu1 %vm3800_vm1, %v3799_v2 }
 0x6e7   :  { %3251 = vmatmul.mubr.msk.f32.gmra.mxu1 %vm358_vm2, %v4922_v29 }
 0x6e8   :  { %3253 = vmatprep.mubr.msk.f32.mxu1 %vm3800_vm1, %v3799_v2 }
 0x6eb   :  { %3254 = vmatmul.mubr.msk.f32.gmra.mxu1 %vm358_vm2, %v4931_v33 }
 0x6ec   :  { %3256 = vmatprep.mubr.msk.f32.mxu1 %vm3800_vm1, %v3799_v2 }
 0x6ef   :  { %3257 = vmatmul.mubr.msk.f32.gmra.mxu1 %vm358_vm2, %v4940_v36 }
 0x6f0   :  { %3259 = vmatprep.mubr.msk.f32.mxu1 %vm3800_vm1, %v3799_v2 }
 0x6f3   :  { %3260 = vmatmul.mubr.msk.f32.gmra.mxu1 %vm358_vm2, %v4949_v39 }
 0x6f4   :  { %3262 = vmatprep.mubr.msk.f32.mxu1 %vm3800_vm1, %v3799_v2 }
 0x6f7   :  { %3263 = vmatmul.mubr.msk.f32.gmra.mxu1 %vm358_vm2, %v4958_v42 }
 0x6f8   :  { %3265 = vmatprep.mubr.msk.f32.mxu1 %vm3800_vm1, %v3799_v2 }
 0x6fb   :  { %3266 = vmatmul.mubr.msk.f32.gmra.mxu1 %vm358_vm2, %v4967_v43 }
 0x6fc   :  { %3268 = vmatprep.mubr.msk.f32.mxu1 %vm3800_vm1, %v3799_v2 }
 0x6ff   :  { %3269 = vmatmul.mubr.msk.f32.gmra.mxu1 %vm358_vm2, %v4976_v44 }
 0x700   :  { %3336 = vmatprep.mubr.msk.f32.mxu1 %vm3800_vm1, %v3799_v2 }
 0x787   :  { %v1940_v45 = vpop.f32.mrf.mxu1 }
 0x788   :  { %v2014_v27 = vadd.f32 %v1940_v45, %v4151_v28 }
 0x789   :  { %v3228_v46 = vpop.f32.mrf.mxu1 }
 0x78a   :  { %v2633_v22 = vmul.f32 -1.442695, %v2014_v27 }
 0x78b   :  { %v1945_v47 = vpop.f32.mrf.mxu1 }
 0x78c   :  { %v2015_v51 = vadd.f32 %v1945_v47, %v4155_v32  ;;  %3647 = vpow2.f32 %v2633_v22 }
 0x78d   :  { %v3231_v48 = vpop.f32.mrf.mxu1 }
 0x78e   :  { %v2634_v9 = vmul.f32 -1.442695, %v2015_v51 }
 0x78f   :  { %v1950_v57 = vpop.f32.mrf.mxu1 }
 0x790   :  { %v2016_v3 = vadd.f32 %v1950_v57, %v4153_v31 }
 0x791   :  { %v3234_v53 = vpop.f32.mrf.mxu1 }
 0x792   :  { %v2635_v16 = vmul.f32 -1.442695, %v2016_v3 }
 0x793   :  { %v1955_v52 = vpop.f32.mrf.mxu1 }
 0x794   :  { %v2017_v49 = vadd.f32 %v1955_v52, %v4157_v37  ;;  %3649 = vpow2.f32 %v2635_v16 }
 0x795   :  { %v3237_v19 = vpop.f32.mrf.mxu1  ;;  %3651 = vpow2.f32 %v2634_v9 }
 0x796   :  { %v2636_v56 = vmul.f32 -1.442695, %v2017_v49 }
 0x797   :  { %v1960_v14 = vpop.f32.mrf.mxu1 }
 0x798   :  { %v2018_v21 = vadd.f32 %v1960_v14, %v4162_v55  ;;  %3653 = vpow2.f32 %v2636_v56 }
 0x799   :  { %v3240_v11 = vpop.f32.mrf.mxu1  ;;  %v3648_v48 = vpop.eup %3647 }
 0x79a   :  { %v2637_v50 = vmul.f32 -1.442695, %v2018_v21  ;;  %v2034_v51 = vadd.f32 1.0, %v3648_v48 }
 0x79b   :  { %v1965_v10 = vpop.f32.mrf.mxu1 }
 0x79c   :  { %3655 = vpow2.f32 %v2637_v50 }
 0x79d   :  { %v3243_v6 = vpop.f32.mrf.mxu1  ;;  %3657 = vrcp.f32 %v2034_v51 }
 0x79f   :  { %v1970_v25 = vpop.f32.mrf.mxu1 }
 0x7a1   :  { %v3246_v45 = vpop.f32.mrf.mxu1  ;;  %v3650_v57 = vpop.eup %3649 }
 0x7a2   :  { %v3652_v53 = vpop.eup %3651  ;;  %v2036_v49 = vadd.f32 1.0, %v3650_v57 }
 0x7a3   :  { %v1975_v46 = vpop.f32.mrf.mxu1  ;;  %v2035_v19 = vadd.f32 1.0, %v3652_v53 }
 0x7a4   :  { %3659 = vrcp.f32 %v2036_v49  ;;  %v2051_v11 = vadd.f32 %v1975_v46, %v4184_v12 }
 0x7a5   :  { %v3249_v47 = vpop.f32.mrf.mxu1  ;;  %v3654_v3 = vpop.eup %3653  ;;  %3661 = vrcp.f32 %v2035_v19 }
 0x7a6   :  { %v2037_v14 = vadd.f32 1.0, %v3654_v3  ;;  %v2050_v47 = vadd.f32 %v1970_v25, %v4191_v15  ;;  %v2640_v53 = vmul.f32 -1.442695, %v2051_v11 }
 0x7a7   :  { %v1980_v27 = vpop.f32.mrf.mxu1 }
 0x7a8   :  { %v2052_v22 = vadd.f32 %v1980_v27, %v4175_v40  ;;  %3663 = vrcp.f32 %v2037_v14  ;;  %v2049_v27 = vadd.f32 %v1965_v10, %v4188_v58  ;;  %v2639_v51 = vmul.f32 -1.442695, %v2050_v47 }
 0x7a9   :  { %v3252_v52 = vpop.f32.mrf.mxu1  ;;  %v3656_v9 = vpop.eup %3655 }
 0x7aa   :  { %v2641_v50 = vmul.f32 -1.442695, %v2052_v22  ;;  %v2038_v6 = vadd.f32 1.0, %v3656_v9  ;;  %v2638_v49 = vmul.f32 -1.442695, %v2049_v27  ;;  %v3658_v9 = vpop.eup %3657 }
 0x7ab   :  { %v1985_v16 = vpop.f32.mrf.mxu1 }
 0x7ac   :  { %v2053_v56 = vadd.f32 %v1985_v16, %v4178_v61  ;;  %3665 = vpow2.f32 %v2641_v50 }
 0x7ad   :  { %v3255_v21 = vpop.f32.mrf.mxu1  ;;  %3667 = vrcp.f32 %v2038_v6 }
 0x7ae   :  { %v2642_v48 = vmul.f32 -1.442695, %v2053_v56 }
 0x7af   :  { %v1990_v45 = vpop.f32.mrf.mxu1 }
 0x7b0   :  { %3669 = vpow2.f32 %v2642_v48  ;;  %v2084_v46 = vadd.f32 %v1990_v45, %v4198_v41 }
 0x7b1   :  { %v3258_v57 = vpop.f32.mrf.mxu1  ;;  %3671 = vpow2.f32 %v2640_v53  ;;  %v3660_v10 = vpop.eup %3659 }
 0x7b2   :  { %3673 = vpow2.f32 %v2639_v51  ;;  %v2089_v14 = vmul.f32 %v3658_v9, %v2084_v46  ;;  %v3662_v21 = vpop.eup %3661 }
 0x7b3   :  { %v1995_v3 = vpop.f32.mrf.mxu1  ;;  %3675 = vpow2.f32 %v2638_v49 }
 0x7b4   :  { %v2085_v25 = vadd.f32 %v1995_v3, %v4194_v23  ;;  %v2094_v27 = vadd.f32 %v2089_v14, %v4205_v26 }
 0x7b5   :  { %v3261_v52 = vpop.f32.mrf.mxu1  ;;  %v3664_v6 = vpop.eup %3663 }
 0x7b6   :  { %v2090_v47 = vmul.f32 %v3662_v21, %v2085_v25 }
 0x7b7   :  { %v2000_v22 = vpop.f32.mrf.mxu1 }
 0x7b8   :  { %v2086_v19 = vadd.f32 %v2000_v22, %v4180_v59  ;;  %v2095_v22 = vadd.f32 %v2090_v47, %v4215_v34 }
 0x7b9   :  { %v3264_v16 = vpop.f32.mrf.mxu1  ;;  %v3666_v57 = vpop.eup %3665 }
 0x7ba   :  { %v2091_v11 = vmul.f32 %v3660_v10, %v2086_v19  ;;  %v3668_v51 = vpop.eup %3667  ;;  %v2072_v9 = vadd.f32 1.0, %v3666_v57 }
 0x7bb   :  { %v2005_v56 = vpop.f32.mrf.mxu1 }
 0x7bc   :  { %v2087_v50 = vadd.f32 %v2005_v56, %v4170_v24  ;;  %v2096_v3 = vadd.f32 %v2091_v11, %v4208_v13 }
 0x7bd   :  { %v3267_v48 = vpop.f32.mrf.mxu1  ;;  %v3670_v46 = vpop.eup %3669 }
 0x7be   :  { %v2092_v45 = vmul.f32 %v3664_v6, %v2087_v50  ;;  %v3672_v25 = vpop.eup %3671  ;;  %v2073_v10 = vadd.f32 1.0, %v3670_v46 }
 0x7bf   :  { %v2010_v53 = vpop.f32.mrf.mxu1  ;;  %v3674_v56 = vpop.eup %3673  ;;  %v2071_v21 = vadd.f32 1.0, %v3672_v25 }
 0x7c0   :  { %v2097_v52 = vadd.f32 %v2092_v45, %v4212_v8  ;;  %v2088_v49 = vadd.f32 %v2010_v53, %v4166_v17  ;;  %v3676_v11 = vpop.eup %3675  ;;  %v2070_v50 = vadd.f32 1.0, %v3674_v56 }
 0x7c1   :  { %v3270_v19 = vpop.f32.mrf.mxu1  ;;  %v2069_v6 = vadd.f32 1.0, %v3676_v11 }
 0x7c2   :  { %3677 = vtanh.f32 %v2097_v52  ;;  %v2093_v16 = vmul.f32 %v3668_v51, %v2088_v49 }
 0x7c3   :  { %3679 = vtanh.f32 %v2094_v27 }
 0x7c4   :  { %3681 = vtanh.f32 %v2096_v3  ;;  %v2098_v14 = vadd.f32 %v2093_v16, %v4224_v38 }
 0x7c5   :  { %3683 = vtanh.f32 %v2095_v22 }
 0x7c6   :  { %3685 = vtanh.f32 %v2098_v14 }
 0x7c7   :  { %3687 = vrcp.f32 %v2072_v9 }
 0x7c8   :  { %3689 = vrcp.f32 %v2073_v10 }
 0x7c9   :  { %3691 = vrcp.f32 %v2071_v21 }
 0x7ca   :  { %3693 = vrcp.f32 %v2070_v50 }
 0x7cb   :  { %3695 = vrcp.f32 %v2069_v6 }
 0x7cf   :  { %v3678_v47 = vpop.eup %3677 }
 0x7d0   :  { %v3680_v48 = vpop.eup %3679  ;;  %v2107_v27 = vsub.f32 %v4830_v0, %v3678_v47 }
 0x7d1   :  { %v3682_v45 = vpop.eup %3681  ;;  %v2104_v10 = vsub.f32 %v4842_v7, %v3680_v48 }
 0x7d2   :  { %v3684_v57 = vpop.eup %3683  ;;  %v2106_v52 = vsub.f32 %v4834_v1, %v3682_v45 }
 0x7d3   :  { %v3686_v53 = vpop.eup %3685  ;;  %v2105_v19 = vsub.f32 %v4838_v30, %v3684_v57 }
 0x7d4   :  { %v3688_v51 = vpop.eup %3687  ;;  %v2108_v3 = vsub.f32 %v4826_v54, %v3686_v53 }
 0x7d5   :  { %v3690_v49 = vpop.eup %3689  ;;  %v2112_v22 = vmul.f32 %v3688_v51, %v2107_v27 }
 0x7d6   :  { %v2113_v46 = vmul.f32 %v3690_v49, %v2108_v3  ;;  %v3692_v16 = vpop.eup %3691 }
 0x7d7   :  { %v2111_v9 = vmul.f32 %v3692_v16, %v2106_v52  ;;  %v3694_v14 = vpop.eup %3693  ;;  %v5010_v0 = vadd.f32 %v3678_v47, %v2112_v22 }
 0x7d8   :  { %v5006_v25 = vadd.f32 %v3686_v53, %v2113_v46  ;;  %v2110_v56 = vmul.f32 %v3694_v14, %v2105_v19  ;;  %v3696_v54 = vpop.eup %3695 }
 0x7d9   :  { %v5014_v1 = vadd.f32 %v3682_v45, %v2111_v9  ;;  %v2109_v30 = vmul.f32 %v3696_v54, %v2104_v10 }
 0x7da   :  { %3272 = vmatpush3.msra.mxu0 %v5006_v25  ;;  %v5018_v21 = vadd.f32 %v3684_v57, %v2110_v56 }
 0x7db   :  { %3273 = vmatprep.subr.mxu0 %v3799_v2  ;;  %v5022_v7 = vadd.f32 %v3680_v48, %v2109_v30 }
 0x7dc   :  { %3274 = vmatpush3.msra.mxu0 %v5010_v0 }
 0x7dd   :  { %3275 = vmatprep.subr.mxu0 %v3799_v2 }
 0x7de   :  { %3276 = vmatpush3.msra.mxu0 %v5014_v1 }
 0x7df   :  { %3277 = vmatprep.subr.mxu0 %v3799_v2 }
 0x7e0   :  { %3278 = vmatpush3.msra.mxu0 %v5018_v21 }
 0x7e1   :  { %3279 = vmatprep.subr.mxu0 %v3799_v2 }
 0x7e2   :  { %3280 = vmatpush3.msra.mxu0 %v5022_v7 }
 0x7e3   :  { %3282 = vmatmul.mubr.msk.f32.vlgmr.msra.gmra.mxu0 %vm358_vm2, %v4849_v20 }
 0x7e4   :  { %3284 = vmatprep.mubr.msk.f32.mxu0 %vm3800_vm1, %v3799_v2 }
 0x7e7   :  { %3285 = vmatmul.mubr.msk.f32.gmra.mxu0 %vm358_vm2, %v4859_v63 }
 0x7e8   :  { %3287 = vmatprep.mubr.msk.f32.mxu0 %vm3800_vm1, %v3799_v2 }
 0x7eb   :  { %3288 = vmatmul.mubr.msk.f32.gmra.mxu0 %vm358_vm2, %v4868_v35 }
 0x7ec   :  { %3290 = vmatprep.mubr.msk.f32.mxu0 %vm3800_vm1, %v3799_v2 }
 0x7ef   :  { %3291 = vmatmul.mubr.msk.f32.gmra.mxu0 %vm358_vm2, %v4877_v18 }
 0x7f0   :  { %3293 = vmatprep.mubr.msk.f32.mxu0 %vm3800_vm1, %v3799_v2 }
 0x7f3   :  { %3294 = vmatmul.mubr.msk.f32.gmra.mxu0 %vm358_vm2, %v4886_v60 }
 0x7f4   :  { %3296 = vmatprep.mubr.msk.f32.mxu0 %vm3800_vm1, %v3799_v2 }
 0x7f7   :  { %3297 = vmatmul.mubr.msk.f32.gmra.mxu0 %vm358_vm2, %v4895_v62 }
 0x7f8   :  { %3299 = vmatprep.mubr.msk.f32.mxu0 %vm3800_vm1, %v3799_v2 }
 0x7fb   :  { %3300 = vmatmul.mubr.msk.f32.gmra.mxu0 %vm358_vm2, %v4904_v5 }
 0x7fc   :  { %3302 = vmatprep.mubr.msk.f32.mxu0 %vm3800_vm1, %v3799_v2 }
 0x7ff   :  { %3303 = vmatmul.mubr.msk.f32.gmra.mxu0 %vm358_vm2, %v4913_v4 }
 0x800   :  { %3305 = vmatprep.mubr.msk.f32.mxu0 %vm3800_vm1, %v3799_v2 }
 0x803   :  { %3306 = vmatmul.mubr.msk.f32.gmra.mxu0 %vm358_vm2, %v4922_v29 }
 0x804   :  { %3308 = vmatprep.mubr.msk.f32.mxu0 %vm3800_vm1, %v3799_v2 }
 0x807   :  { %3309 = vmatmul.mubr.msk.f32.gmra.mxu0 %vm358_vm2, %v4931_v33 }
 0x808   :  { %3311 = vmatprep.mubr.msk.f32.mxu0 %vm3800_vm1, %v3799_v2 }
 0x80b   :  { %3312 = vmatmul.mubr.msk.f32.gmra.mxu0 %vm358_vm2, %v4940_v36 }
 0x80c   :  { %3314 = vmatprep.mubr.msk.f32.mxu0 %vm3800_vm1, %v3799_v2 }
 0x80f   :  { %3315 = vmatmul.mubr.msk.f32.gmra.mxu0 %vm358_vm2, %v4949_v39 }
 0x810   :  { %3317 = vmatprep.mubr.msk.f32.mxu0 %vm3800_vm1, %v3799_v2 }
 0x813   :  { %3318 = vmatmul.mubr.msk.f32.gmra.mxu0 %vm358_vm2, %v4958_v42 }
 0x814   :  { %3320 = vmatprep.mubr.msk.f32.mxu0 %vm3800_vm1, %v3799_v2 }
 0x817   :  { %3321 = vmatmul.mubr.msk.f32.gmra.mxu0 %vm358_vm2, %v4967_v43 }
 0x818   :  { %3323 = vmatprep.mubr.msk.f32.mxu0 %vm3800_vm1, %v3799_v2 }
 0x81b   :  { %3324 = vmatmul.mubr.msk.f32.gmra.mxu0 %vm358_vm2, %v4976_v44 }
 0x8a3   :  { %v2185_v20 = vpop.f32.mrf.mxu0 }
 0x8a4   :  { %v2259_v62 = vadd.f32 %v2185_v20, %v4151_v28 }
 0x8a5   :  { %v3283_v63 = vpop.f32.mrf.mxu0 }
 0x8a6   :  { %v2658_v39 = vmul.f32 -1.442695, %v2259_v62 }
 0x8a7   :  { %v2190_v35 = vpop.f32.mrf.mxu0 }
 0x8a8   :  { %v2260_v29 = vadd.f32 %v2190_v35, %v4155_v32  ;;  %3697 = vpow2.f32 %v2658_v39 }
 0x8a9   :  { %v3286_v18 = vpop.f32.mrf.mxu0 }
 0x8aa   :  { %v2659_v11 = vmul.f32 -1.442695, %v2260_v29 }
 0x8ab   :  { %v2195_v60 = vpop.f32.mrf.mxu0 }
 0x8ac   :  { %v2261_v4 = vadd.f32 %v2195_v60, %v4153_v31 }
 0x8ad   :  { %v3289_v5 = vpop.f32.mrf.mxu0 }
 0x8ae   :  { %v2660_v43 = vmul.f32 -1.442695, %v2261_v4 }
 0x8af   :  { %v2200_v33 = vpop.f32.mrf.mxu0 }
 0x8b0   :  { %v2262_v36 = vadd.f32 %v2200_v33, %v4157_v37  ;;  %3699 = vpow2.f32 %v2660_v43 }
 0x8b1   :  { %v3292_v42 = vpop.f32.mrf.mxu0  ;;  %3701 = vpow2.f32 %v2659_v11 }
 0x8b2   :  { %v2661_v50 = vmul.f32 -1.442695, %v2262_v36 }
 0x8b3   :  { %v2205_v44 = vpop.f32.mrf.mxu0 }
 0x8b4   :  { %v2263_v6 = vadd.f32 %v2205_v44, %v4162_v55  ;;  %3703 = vpow2.f32 %v2661_v50 }
 0x8b5   :  { %v3295_v47 = vpop.f32.mrf.mxu0  ;;  %v3698_v27 = vpop.eup %3697 }
 0x8b6   :  { %v2662_v28 = vmul.f32 -1.442695, %v2263_v6  ;;  %v2279_v49 = vadd.f32 1.0, %v3698_v27 }
 0x8b7   :  { %v2210_v48 = vpop.f32.mrf.mxu0 }
 0x8b8   :  { %3705 = vpow2.f32 %v2662_v28  ;;  %v2294_v60 = vadd.f32 %v2210_v48, %v4188_v58 }
 0x8b9   :  { %v3298_v31 = vpop.f32.mrf.mxu0  ;;  %3707 = vrcp.f32 %v2279_v49 }
 0x8ba   :  { %v2663_v29 = vmul.f32 -1.442695, %v2294_v60 }
 0x8bb   :  { %v2215_v32 = vpop.f32.mrf.mxu0 }
 0x8bc   :  { %v2295_v35 = vadd.f32 %v2215_v32, %v4191_v15 }
 0x8bd   :  { %v3301_v45 = vpop.f32.mrf.mxu0  ;;  %v3700_v53 = vpop.eup %3699 }
 0x8be   :  { %v3702_v3 = vpop.eup %3701  ;;  %v2281_v46 = vadd.f32 1.0, %v3700_v53  ;;  %v2664_v5 = vmul.f32 -1.442695, %v2295_v35 }
 0x8bf   :  { %v2220_v37 = vpop.f32.mrf.mxu0  ;;  %v2280_v19 = vadd.f32 1.0, %v3702_v3 }
 0x8c0   :  { %3709 = vrcp.f32 %v2281_v46  ;;  %v2296_v54 = vadd.f32 %v2220_v37, %v4184_v12 }
 0x8c1   :  { %v3304_v57 = vpop.f32.mrf.mxu0  ;;  %v3704_v52 = vpop.eup %3703  ;;  %3711 = vrcp.f32 %v2280_v19 }
 0x8c2   :  { %v2282_v10 = vadd.f32 1.0, %v3704_v52  ;;  %v2665_v62 = vmul.f32 -1.442695, %v2296_v54 }
 0x8c3   :  { %v2225_v51 = vpop.f32.mrf.mxu0 }
 0x8c4   :  { %v2297_v22 = vadd.f32 %v2225_v51, %v4175_v40  ;;  %3713 = vrcp.f32 %v2282_v10 }
 0x8c5   :  { %v3307_v55 = vpop.f32.mrf.mxu0  ;;  %v3706_v9 = vpop.eup %3705 }
 0x8c6   :  { %v2666_v30 = vmul.f32 -1.442695, %v2297_v22  ;;  %v2283_v20 = vadd.f32 1.0, %v3706_v9  ;;  %v3708_v42 = vpop.eup %3707 }
 0x8c7   :  { %v2230_v16 = vpop.f32.mrf.mxu0 }
 0x8c8   :  { %v2298_v14 = vadd.f32 %v2230_v16, %v4178_v61  ;;  %3715 = vpow2.f32 %v2666_v30 }
 0x8c9   :  { %v3310_v56 = vpop.f32.mrf.mxu0  ;;  %3717 = vrcp.f32 %v2283_v20 }
 0x8ca   :  { %v2667_v18 = vmul.f32 -1.442695, %v2298_v14 }
 0x8cb   :  { %v2235_v63 = vpop.f32.mrf.mxu0 }
 0x8cc   :  { %3719 = vpow2.f32 %v2667_v18  ;;  %v2329_v12 = vadd.f32 %v2235_v63, %v4198_v41 }
 0x8cd   :  { %v3313_v40 = vpop.f32.mrf.mxu0  ;;  %3721 = vpow2.f32 %v2665_v62  ;;  %v3710_v58 = vpop.eup %3709 }
 0x8ce   :  { %3723 = vpow2.f32 %v2664_v5  ;;  %v2334_v43 = vmul.f32 %v3708_v42, %v2329_v12  ;;  %v3712_v44 = vpop.eup %3711 }
 0x8cf   :  { %v2240_v61 = vpop.f32.mrf.mxu0  ;;  %3725 = vpow2.f32 %v2663_v29 }
 0x8d0   :  { %v2330_v15 = vadd.f32 %v2240_v61, %v4194_v23  ;;  %v2339_v32 = vadd.f32 %v2334_v43, %v4205_v26 }
 0x8d1   :  { %v3316_v4 = vpop.f32.mrf.mxu0  ;;  %v3714_v47 = vpop.eup %3713 }
 0x8d2   :  { %v2335_v28 = vmul.f32 %v3712_v44, %v2330_v15 }
 0x8d3   :  { %v2245_v33 = vpop.f32.mrf.mxu0 }
 0x8d4   :  { %v2331_v36 = vadd.f32 %v2245_v33, %v4180_v59  ;;  %v2340_v53 = vadd.f32 %v2335_v28, %v4215_v34 }
 0x8d5   :  { %v3319_v39 = vpop.f32.mrf.mxu0  ;;  %v3716_v31 = vpop.eup %3715 }
 0x8d6   :  { %v2336_v50 = vmul.f32 %v3710_v58, %v2331_v36  ;;  %v3718_v45 = vpop.eup %3717  ;;  %v2317_v52 = vadd.f32 1.0, %v3716_v31 }
 0x8d7   :  { %v2250_v11 = vpop.f32.mrf.mxu0 }
 0x8d8   :  { %v2332_v6 = vadd.f32 %v2250_v11, %v4170_v24  ;;  %v2341_v23 = vadd.f32 %v2336_v50, %v4208_v13 }
 0x8d9   :  { %v3322_v48 = vpop.f32.mrf.mxu0  ;;  %v3720_v27 = vpop.eup %3719 }
 0x8da   :  { %v2337_v41 = vmul.f32 %v3714_v47, %v2332_v6  ;;  %v3722_v3 = vpop.eup %3721  ;;  %v2318_v49 = vadd.f32 1.0, %v3720_v27 }
 0x8db   :  { %v2255_v59 = vpop.f32.mrf.mxu0  ;;  %v3724_v55 = vpop.eup %3723  ;;  %v2316_v13 = vadd.f32 1.0, %v3722_v3 }
 0x8dc   :  { %v2342_v37 = vadd.f32 %v2337_v41, %v4212_v8  ;;  %v2333_v57 = vadd.f32 %v2255_v59, %v4166_v17  ;;  %v3726_v8 = vpop.eup %3725  ;;  %v2315_v17 = vadd.f32 1.0, %v3724_v55 }
 0x8dd   :  { %v3325_v51 = vpop.f32.mrf.mxu0  ;;  %v2314_v46 = vadd.f32 1.0, %v3726_v8 }
 0x8de   :  { %3727 = vtanh.f32 %v2342_v37  ;;  %v2338_v24 = vmul.f32 %v3718_v45, %v2333_v57 }
 0x8df   :  { %3729 = vtanh.f32 %v2339_v32 }
 0x8e0   :  { %3731 = vtanh.f32 %v2341_v23  ;;  %v2343_v26 = vadd.f32 %v2338_v24, %v4224_v38 }
 0x8e1   :  { %3733 = vtanh.f32 %v2340_v53 }
 0x8e2   :  { %3735 = vtanh.f32 %v2343_v26 }
 0x8e3   :  { %3737 = vrcp.f32 %v2317_v52 }
 0x8e4   :  { %3739 = vrcp.f32 %v2318_v49 }
 0x8e5   :  { %3741 = vrcp.f32 %v2316_v13 }
 0x8e6   :  { %3743 = vrcp.f32 %v2315_v17 }
 0x8e7   :  { %3745 = vrcp.f32 %v2314_v46 }
 0x8eb   :  { %v3728_v34 = vpop.eup %3727 }
 0x8ec   :  { %v3730_v22 = vpop.eup %3729  ;;  %v2352_v9 = vsub.f32 %v5010_v0, %v3728_v34 }
 0x8ed   :  { %v3732_v19 = vpop.eup %3731  ;;  %v2349_v60 = vsub.f32 %v5022_v7, %v3730_v22  ;;  %v2364_v7 = vld [vmem:[%s5124_s4] sm:$0xff] }
 0x8ee   :  { %v3734_v16 = vpop.eup %3733  ;;  %v2351_v56 = vsub.f32 %v5014_v1, %v3732_v19 }
 0x8ef   :  { %v3736_v10 = vpop.eup %3735  ;;  %v2350_v63 = vsub.f32 %v5018_v21, %v3734_v16 }
 0x8f0   :  { %v3738_v38 = vpop.eup %3737  ;;  %v2353_v14 = vsub.f32 %v5006_v25, %v3736_v10 }
 0x8f1   :  { %v3740_v54 = vpop.eup %3739  ;;  %v2357_v20 = vmul.f32 %v3738_v38, %v2352_v9 }
 0x8f2   :  { %v2358_v30 = vmul.f32 %v3740_v54, %v2353_v14  ;;  %v3742_v35 = vpop.eup %3741 }
 0x8f3   :  { %v2356_v40 = vmul.f32 %v3742_v35, %v2351_v56  ;;  %v3744_v62 = vpop.eup %3743  ;;  %v2362_v61 = vadd.f32 %v3728_v34, %v2357_v20 }
 0x8f4   :  { %v2363_v18 = vadd.f32 %v3736_v10, %v2358_v30  ;;  %v2355_v0 = vmul.f32 %v3744_v62, %v2350_v63  ;;  %v3746_v5 = vpop.eup %3745 }
 0x8f5   :  { %v2361_v25 = vadd.f32 %v3732_v19, %v2356_v40  ;;  %v2354_v1 = vmul.f32 %v3746_v5, %v2349_v60 }
 0x8f6   :  { %3327 = vmatpush3.msra.mxu1 %v2363_v18  ;;  %v2360_v4 = vadd.f32 %v3734_v16, %v2355_v0 }
 0x8f7   :  { %3328 = vmatprep.subr.mxu1 %v3799_v2  ;;  %v2359_v21 = vadd.f32 %v3730_v22, %v2354_v1 }
 0x8f8   :  { %3329 = vmatpush3.msra.mxu1 %v2362_v61 }
 0x8f9   :  { %3330 = vmatprep.subr.mxu1 %v3799_v2 }
 0x8fa   :  { %3331 = vmatpush3.msra.mxu1 %v2361_v25 }
 0x8fb   :  { %3332 = vmatprep.subr.mxu1 %v3799_v2 }
 0x8fc   :  { %3333 = vmatpush3.msra.mxu1 %v2360_v4 }
 0x8fd   :  { %3334 = vmatprep.subr.mxu1 %v3799_v2 }
 0x8fe   :  { %3335 = vmatpush3.msra.mxu1 %v2359_v21 }
 0x8ff   :  { %3337 = vmatmul.mubr.msk.f32.vlgmr.msra.gmra.mxu1 %vm358_vm2, %v2364_v7 }
 0x9bf   :  { %v2434_v29 = vpop.f32.mrf.mxu1 }
 0x9c0   :  { %2438 = vst [vmem:[#allocation2] sm:$0xff] %v2434_v29 }
 0x9c1   :  { %v3338_v12 = vpop.f32.mrf.mxu1 }
 0x9c2   :  { %3788 = shalt.err (!%p3785_p4)
}
 0x9c3   :  { %2448 = dma.vmem_to_hbm [thread:$0]  %s2446_s19, 128, %s5125_s5, [#allocation3]  }
 0x9c4   :  { %3797 = dma.done.wait [#allocation3], 128  }
 0x9c5   :  { %3798 = vsyncadd [#allocation3], 4294967168 }
 0x9c6   :  { %2452 = vsyncpa [#allocation3], 1 }

</bundles_post_ra>
